<compile_context>
chip_gen: v5e
topology: v5e:2x2
jax: 0.10.0
libtpu: 0.0.40
codegen_flags: <defaults>
</compile_context>

<pallas_src>
import functools

import jax
import jax.numpy as jnp
from jax.experimental import pallas as pl
from jax.experimental.pallas import tpu as pltpu


def _round_up(x, m):
    return ((x + m - 1) // m) * m


_PACKED_ORDER = ["w1", "b1", "w2", "b2", "w3", "b3",
                 "wh", "bh", "wp2", "bp2", "wop", "wor", "bo"]

_HEAD_COLS = 40      # 33 real head channels padded up to a multiple of 8

# row ranges of each head inside the 40-wide fused output slab
_HEAD_SLICES = {
    "pose_pred":   (0, 6),
    "dof_pred":    (6, 12),
    "joint0_pred": (12, 19),
    "joint1_pred": (19, 26),
    "joint2_pred": (26, 33),
}


# ---------------------------------------------------------------------------
# Fused Pallas kernel: backbone MLP + all 5 heads for one (batch, col-tile).
# Everything is in (channels, points) layout so outputs match PyTorch (B,C,N)
# with no in-kernel transposes.
# ---------------------------------------------------------------------------
def _fused_kernel(x_ref,
                  w1_ref, b1_ref, w2_ref, b2_ref, w3_ref, b3_ref,
                  wh_ref, bh_ref, wp2_ref, bp2_ref,
                  wop_ref, wor_ref, bo_ref,
                  feat_t_ref, head_t_ref):
    bf16 = jnp.bfloat16

    def dense(w_ref, b_ref, a, relu):
        # w_ref: (cout, cin) bf16, a: (cin, tn) bf16, b_ref: (cout, 1) f32
        y = jnp.dot(w_ref[...], a, preferred_element_type=jnp.float32)
        y = y + b_ref[...]
        if relu:
            y = jnp.maximum(y, 0.0)
        return y

    x = x_ref[...]                                         # (8, tn) bf16

    # ---- backbone shared MLP (stand-in for Pointnet2Backbone) ----
    h = dense(w1_ref, b1_ref, x, True).astype(bf16)        # (32, tn)
    h = dense(w2_ref, b2_ref, h, True).astype(bf16)        # (64, tn)
    feat = dense(w3_ref, b3_ref, h, True)                  # (128, tn) f32

    # seed_features already in PyTorch (C, N) layout.
    feat_t_ref[...] = feat.astype(feat_t_ref.dtype)
    feat_b = feat.astype(bf16)

    # ---- heads: concatenated first hidden layers (pose|dof|j0|j1|j2) ----
    hid = dense(wh_ref, bh_ref, feat_b, True).astype(bf16)          # (640, tn)
    # pose head has a second hidden layer
    pose_h2 = dense(wp2_ref, bp2_ref, hid[:128, :], True).astype(bf16)  # (128, tn)

    # single lane-dense 40-row output slab (rows 0..32 meaningful, rest zero)
    out = (jnp.dot(wop_ref[...], pose_h2, preferred_element_type=jnp.float32)
           + jnp.dot(wor_ref[...], hid[128:, :], preferred_element_type=jnp.float32)
           + bo_ref[...])                                   # (40, tn)
    head_t_ref[...] = out.astype(head_t_ref.dtype)


def _fused_forward(pc_t, packed, tn, vmem_limit_bytes):
    B, cin_pad, N_pad = pc_t.shape
    grid = (B, N_pad // tn)

    in_specs = [pl.BlockSpec((None, cin_pad, tn), lambda b, i: (b, 0, i))]
    in_specs += [pl.BlockSpec(packed[name].shape, lambda b, i: (0, 0))
                 for name in _PACKED_ORDER]

    feat_spec = pl.BlockSpec((None, 128, tn), lambda b, i: (b, 0, i))
    head_spec = pl.BlockSpec((None, _HEAD_COLS, tn), lambda b, i: (b, 0, i))

    feat_t, head_t = pl.pallas_call(
        _fused_kernel,
        out_shape=(jax.ShapeDtypeStruct((B, 128, N_pad), jnp.float32),
                   jax.ShapeDtypeStruct((B, _HEAD_COLS, N_pad), jnp.float32)),
        grid=grid,
        in_specs=in_specs,
        out_specs=(feat_spec, head_spec),
        compiler_params=pltpu.CompilerParams(
            dimension_semantics=("parallel", "parallel"),
            vmem_limit_bytes=vmem_limit_bytes),
    )(pc_t, *[packed[name] for name in _PACKED_ORDER])
    return feat_t, head_t


# ---------------------------------------------------------------------------
# Deterministic parameter construction (same structure as the PyTorch heads)
# ---------------------------------------------------------------------------
def _make_linear_params(key, cin, cout, scale=0.1):
    kw, kb = jax.random.split(key)
    w = scale * jax.random.normal(kw, (cin, cout), dtype=jnp.float32)
    b = scale * jax.random.normal(kb, (cout,), dtype=jnp.float32)
    return w, b


def make_params(key, in_dim=6, feat_dim=128, hidden=128):
    keys = jax.random.split(key, 32)
    ki = iter(range(32))
    p = {}

    # Backbone shared-MLP (stand-in for Pointnet2Backbone's SA/FP stack).
    p["backbone"] = [
        (*_make_linear_params(keys[next(ki)], in_dim, 32), True),
        (*_make_linear_params(keys[next(ki)], 32, 64), True),
        (*_make_linear_params(keys[next(ki)], 64, feat_dim), True),
    ]

    # grasp_pre_eulor: pose head -> 6 outputs (3 euler + 3 translation)
    p["pose"] = [
        (*_make_linear_params(keys[next(ki)], feat_dim, hidden), True),
        (*_make_linear_params(keys[next(ki)], hidden, hidden), True),
        (*_make_linear_params(keys[next(ki)], hidden, 6), False),
    ]

    # pre_joint(6, 'dof') and pre_joint(7, '0'/'1'/'2')
    def joint_head(out_dim):
        return [
            (*_make_linear_params(keys[next(ki)], feat_dim, hidden), True),
            (*_make_linear_params(keys[next(ki)], hidden, out_dim), False),
        ]

    p["dof"] = joint_head(6)
    p["joint0"] = joint_head(7)
    p["joint1"] = joint_head(7)
    p["joint2"] = joint_head(7)
    return p


def pack_params(p):
    """Pack per-layer params into fused/concatenated transposed bf16 matrices
    for the (C, N)-layout kernel (weights stored as (cout, cin))."""
    (w1, b1, _), (w2, b2, _), (w3, b3, _) = p["backbone"]
    feat_dim = w3.shape[1]
    assert feat_dim == 128, "fused packing assumes feat_dim == 128"

    # pad backbone input channels 6 -> 8 (aligned K), store transposed
    cin = w1.shape[0]
    assert cin <= 8
    w1t = jnp.zeros((w1.shape[1], 8), jnp.float32).at[:, :cin].set(w1.T)

    (wp1, bp1, _), (wp2, bp2, _), (wp3, bp3, _) = p["pose"]
    (wd1, bd1, _), (wd2, bd2, _) = p["dof"]
    (wj01, bj01, _), (wj02, bj02, _) = p["joint0"]
    (wj11, bj11, _), (wj12, bj12, _) = p["joint1"]
    (wj21, bj21, _), (wj22, bj22, _) = p["joint2"]
    assert wp1.shape[1] == 128 and wd1.shape[1] == 128, "hidden must be 128"

    # concatenated first hidden layers of the 5 heads: (640, 128)
    wht = jnp.concatenate([wp1.T, wd1.T, wj01.T, wj11.T, wj21.T], axis=0)
    bh = jnp.concatenate([bp1, bd1, bj01, bj11, bj21], axis=0)       # (640,)

    # block-diagonal final projections into one 40-row slab
    wopt = jnp.zeros((_HEAD_COLS, 128), jnp.float32).at[0:6, :].set(wp3.T)
    wort = jnp.zeros((_HEAD_COLS, 512), jnp.float32)
    wort = wort.at[6:12, 0:128].set(wd2.T)        # dof
    wort = wort.at[12:19, 128:256].set(wj02.T)    # joint0
    wort = wort.at[19:26, 256:384].set(wj12.T)    # joint1
    wort = wort.at[26:33, 384:512].set(wj22.T)    # joint2
    bo = jnp.zeros((_HEAD_COLS,), jnp.float32)
    bo = bo.at[0:6].set(bp3).at[6:12].set(bd2).at[12:19].set(bj02)
    bo = bo.at[19:26].set(bj12).at[26:33].set(bj22)

    def bf16(w):
        return w.astype(jnp.bfloat16)

    def col(b):
        return b.reshape(-1, 1)    # (cout, 1) f32, broadcast along lanes

    return {
        "w1": bf16(w1t), "b1": col(b1),
        "w2": bf16(w2.T), "b2": col(b2),
        "w3": bf16(w3.T), "b3": col(b3),
        "wh": bf16(wht), "bh": col(bh),
        "wp2": bf16(wp2.T), "bp2": col(bp2),
        "wop": bf16(wopt), "wor": bf16(wort), "bo": col(bo),
    }


# ---------------------------------------------------------------------------
# Per-generation tiling / VMEM limits
# ---------------------------------------------------------------------------
def pick_tile_and_vmem():
    kind = jax.devices()[0].device_kind.lower()
    if "v6" in kind:
        # v6e: 128 MiB physical VMEM, near HBM/MXU balance -> biggest tiles.
        return 2048, 64 * 1024 * 1024
    # v5e/v5p: compute-bound, 1024 amortizes per-step overhead.
    # v7x / unknown: only 64 MiB VMEM, 2 TCs -> keep 1024 / 48 MiB.
    return 1024, 48 * 1024 * 1024


# ---------------------------------------------------------------------------
# Forward pass (mirrors Grasp_baseline.forward)
# ---------------------------------------------------------------------------
def grasp_baseline_forward(pc, packed, *, max_tile=1024,
                           vmem_limit_bytes=48 * 1024 * 1024):
    """pc: (B, N, 3 + input_feature_dim) float32, like the PyTorch module."""
    B, N, Cin = pc.shape
    assert Cin <= 8
    cin_pad = 8
    tn = min(max_tile, _round_up(N, 128))
    n_pad = _round_up(N, tn)

    # pad channels 6->8, transpose once to (B, 8, N), pad N, cast to bf16
    pc_t = jnp.pad(pc, ((0, 0), (0, 0), (0, cin_pad - Cin))).transpose(0, 2, 1)
    pc_t = jnp.pad(pc_t, ((0, 0), (0, 0), (0, n_pad - N))).astype(jnp.bfloat16)

    feat_t, head_t = _fused_forward(pc_t, packed, tn, vmem_limit_bytes)

    end_points = {}
    end_points["seed_xyz"] = pc[:, :, :3]                  # (B, N, 3)
    end_points["seed_features"] = feat_t[:, :, :N]         # (B, 128, N)
    for name, (lo, hi) in _HEAD_SLICES.items():
        end_points[name] = head_t[:, lo:hi, :N]            # (B, C_head, N)
    return end_points


# ---------------------------------------------------------------------------
# Pure-JAX f32 reference (original per-head structure) for validation
# ---------------------------------------------------------------------------
def _reference_forward(pc, params):
    def mlp(x, layers):
        for w, b, relu in layers:
            x = x @ w + b
            if relu:
                x = jnp.maximum(x, 0.0)
        return x

    B, N, Cin = pc.shape
    x = pc.reshape(B * N, Cin)
    feat = mlp(x, params["backbone"])
    ep = {
        "seed_xyz": pc[:, :, :3],
        "seed_features": feat.reshape(B, N, -1).transpose(0, 2, 1),
    }
    for pkey, okey in [("pose", "pose_pred"), ("dof", "dof_pred"),
                       ("joint0", "joint0_pred"), ("joint1", "joint1_pred"),
                       ("joint2", "joint2_pred")]:
        out = mlp(feat, params[pkey])
        ep[okey] = out.reshape(B, N, -1).transpose(0, 2, 1)
    return ep


# ---------------------------------------------------------------------------
if __name__ == "__main__":
    key = jax.random.PRNGKey(0)
    k_pc, k_params = jax.random.split(key)

    B, N, IN_DIM = 2, 128, 6      # xyz + 3 extra features (input_feature_dim=3)
    pc = jax.random.normal(k_pc, (B, N, IN_DIM), dtype=jnp.float32)

    params = make_params(k_params, in_dim=IN_DIM, feat_dim=128, hidden=128)
    packed = pack_params(params)

    max_tile, vmem_limit = pick_tile_and_vmem()
    fwd = jax.jit(functools.partial(grasp_baseline_forward,
                                    max_tile=max_tile,
                                    vmem_limit_bytes=vmem_limit))
    end_points = fwd(pc, packed)
    end_points = jax.block_until_ready(end_points)

    # shape checks
    assert end_points["seed_xyz"].shape == (B, N, 3)
    assert end_points["seed_features"].shape == (B, 128, N)
    assert end_points["pose_pred"].shape == (B, 6, N)
    assert end_points["dof_pred"].shape == (B, 6, N)
    assert end_points["joint0_pred"].shape == (B, 7, N)
    assert end_points["joint1_pred"].shape == (B, 7, N)
    assert end_points["joint2_pred"].shape == (B, 7, N)

    # numeric check vs pure-JAX f32 reference (bf16 MXU -> loose tolerance)
    ref = _reference_forward(pc, params)
    for name in ["seed_features", "pose_pred", "dof_pred",
                 "joint0_pred", "joint1_pred", "joint2_pred"]:
        err = float(jnp.max(jnp.abs(end_points[name] - ref[name])))
        assert err < 5e-2, (name, err)

    print("KERNEL_OK")
</pallas_src>

<mosaic_0001>
module attributes {stable_mosaic.version = 11 : i64} {
  func.func @_fused_kernel(%arg0: i32, %arg1: i32, %arg2: memref<1x8x128xbf16, #tpu.memory_space<vmem>>, %arg3: memref<32x8xbf16, #tpu.memory_space<vmem>>, %arg4: memref<32x1xf32, #tpu.memory_space<vmem>>, %arg5: memref<64x32xbf16, #tpu.memory_space<vmem>>, %arg6: memref<64x1xf32, #tpu.memory_space<vmem>>, %arg7: memref<128x64xbf16, #tpu.memory_space<vmem>>, %arg8: memref<128x1xf32, #tpu.memory_space<vmem>>, %arg9: memref<640x128xbf16, #tpu.memory_space<vmem>>, %arg10: memref<640x1xf32, #tpu.memory_space<vmem>>, %arg11: memref<128x128xbf16, #tpu.memory_space<vmem>>, %arg12: memref<128x1xf32, #tpu.memory_space<vmem>>, %arg13: memref<40x128xbf16, #tpu.memory_space<vmem>>, %arg14: memref<40x512xbf16, #tpu.memory_space<vmem>>, %arg15: memref<40x1xf32, #tpu.memory_space<vmem>>, %arg16: memref<1x128x128xf32, #tpu.memory_space<vmem>>, %arg17: memref<1x40x128xf32, #tpu.memory_space<vmem>>) attributes {dimension_semantics = [#tpu.dimension_semantics<parallel>, #tpu.dimension_semantics<parallel>], iteration_bounds = array<i64: 2, 1>, scalar_prefetch = 0 : i64, scratch_operands = 0 : i64, tpu.core_type = #tpu.core_type<tc>, window_params = [{transform_indices = @transform_0, window_bounds = array<i64: 1, 8, 128>}, {pipeline_mode = #tpu.pipeline_mode<synchronous>, transform_indices = @transform_1, window_bounds = array<i64: 32, 8>}, {pipeline_mode = #tpu.pipeline_mode<synchronous>, transform_indices = @transform_2, window_bounds = array<i64: 32, 1>}, {pipeline_mode = #tpu.pipeline_mode<synchronous>, transform_indices = @transform_3, window_bounds = array<i64: 64, 32>}, {pipeline_mode = #tpu.pipeline_mode<synchronous>, transform_indices = @transform_4, window_bounds = array<i64: 64, 1>}, {pipeline_mode = #tpu.pipeline_mode<synchronous>, transform_indices = @transform_5, window_bounds = array<i64: 128, 64>}, {pipeline_mode = #tpu.pipeline_mode<synchronous>, transform_indices = @transform_6, window_bounds = array<i64: 128, 1>}, {pipeline_mode = #tpu.pipeline_mode<synchronous>, transform_indices = @transform_7, window_bounds = array<i64: 640, 128>}, {pipeline_mode = #tpu.pipeline_mode<synchronous>, transform_indices = @transform_8, window_bounds = array<i64: 640, 1>}, {pipeline_mode = #tpu.pipeline_mode<synchronous>, transform_indices = @transform_9, window_bounds = array<i64: 128, 128>}, {pipeline_mode = #tpu.pipeline_mode<synchronous>, transform_indices = @transform_10, window_bounds = array<i64: 128, 1>}, {pipeline_mode = #tpu.pipeline_mode<synchronous>, transform_indices = @transform_11, window_bounds = array<i64: 40, 128>}, {pipeline_mode = #tpu.pipeline_mode<synchronous>, transform_indices = @transform_12, window_bounds = array<i64: 40, 512>}, {pipeline_mode = #tpu.pipeline_mode<synchronous>, transform_indices = @transform_13, window_bounds = array<i64: 40, 1>}, {transform_indices = @transform_14, window_bounds = array<i64: 1, 128, 128>}, {transform_indices = @transform_15, window_bounds = array<i64: 1, 40, 128>}]} {
    %c0 = arith.constant 0 : index
    %c0_0 = arith.constant 0 : index
    %c0_1 = arith.constant 0 : index
    %0 = vector.load %arg2[%c0, %c0_0, %c0_1] : memref<1x8x128xbf16, #tpu.memory_space<vmem>>, vector<1x8x128xbf16>
    %1 = vector.shape_cast %0 : vector<1x8x128xbf16> to vector<8x128xbf16>
    %c0_2 = arith.constant 0 : index
    %c0_3 = arith.constant 0 : index
    %2 = vector.load %arg3[%c0_2, %c0_3] : memref<32x8xbf16, #tpu.memory_space<vmem>>, vector<32x8xbf16>
    %cst = arith.constant dense<0.000000e+00> : vector<32x128xf32>
    %3 = tpu.matmul %2, %1, %cst {dimension_numbers = #tpu.dot_dimension_numbers<[1], [0], [0], [1], [0, 0, 1, 1], [], []>} : vector<32x8xbf16>, vector<8x128xbf16>, vector<32x128xf32> -> vector<32x128xf32>
    %c0_4 = arith.constant 0 : index
    %c0_5 = arith.constant 0 : index
    %4 = vector.load %arg4[%c0_4, %c0_5] : memref<32x1xf32, #tpu.memory_space<vmem>>, vector<32x1xf32>
    %5 = vector.broadcast %4 : vector<32x1xf32> to vector<32x128xf32>
    %6 = arith.addf %3, %5 : vector<32x128xf32>
    %cst_6 = arith.constant 0.000000e+00 : f32
    %7 = vector.broadcast %cst_6 : f32 to vector<32x128xf32>
    %8 = arith.maximumf %6, %7 : vector<32x128xf32>
    %9 = arith.truncf %8 : vector<32x128xf32> to vector<32x128xbf16>
    %c0_7 = arith.constant 0 : index
    %c0_8 = arith.constant 0 : index
    %10 = vector.load %arg5[%c0_7, %c0_8] : memref<64x32xbf16, #tpu.memory_space<vmem>>, vector<64x32xbf16>
    %cst_9 = arith.constant dense<0.000000e+00> : vector<64x128xf32>
    %11 = tpu.matmul %10, %9, %cst_9 {dimension_numbers = #tpu.dot_dimension_numbers<[1], [0], [0], [1], [0, 0, 1, 1], [], []>} : vector<64x32xbf16>, vector<32x128xbf16>, vector<64x128xf32> -> vector<64x128xf32>
    %c0_10 = arith.constant 0 : index
    %c0_11 = arith.constant 0 : index
    %12 = vector.load %arg6[%c0_10, %c0_11] : memref<64x1xf32, #tpu.memory_space<vmem>>, vector<64x1xf32>
    %13 = vector.broadcast %12 : vector<64x1xf32> to vector<64x128xf32>
    %14 = arith.addf %11, %13 : vector<64x128xf32>
    %cst_12 = arith.constant 0.000000e+00 : f32
    %15 = vector.broadcast %cst_12 : f32 to vector<64x128xf32>
    %16 = arith.maximumf %14, %15 : vector<64x128xf32>
    %17 = arith.truncf %16 : vector<64x128xf32> to vector<64x128xbf16>
    %c0_13 = arith.constant 0 : index
    %c0_14 = arith.constant 0 : index
    %18 = vector.load %arg7[%c0_13, %c0_14] : memref<128x64xbf16, #tpu.memory_space<vmem>>, vector<128x64xbf16>
    %cst_15 = arith.constant dense<0.000000e+00> : vector<128x128xf32>
    %19 = tpu.matmul %18, %17, %cst_15 {dimension_numbers = #tpu.dot_dimension_numbers<[1], [0], [0], [1], [0, 0, 1, 1], [], []>} : vector<128x64xbf16>, vector<64x128xbf16>, vector<128x128xf32> -> vector<128x128xf32>
    %c0_16 = arith.constant 0 : index
    %c0_17 = arith.constant 0 : index
    %20 = vector.load %arg8[%c0_16, %c0_17] : memref<128x1xf32, #tpu.memory_space<vmem>>, vector<128x1xf32>
    %21 = vector.broadcast %20 : vector<128x1xf32> to vector<128x128xf32>
    %22 = arith.addf %19, %21 : vector<128x128xf32>
    %cst_18 = arith.constant 0.000000e+00 : f32
    %23 = vector.broadcast %cst_18 : f32 to vector<128x128xf32>
    %24 = arith.maximumf %22, %23 : vector<128x128xf32>
    %c0_19 = arith.constant 0 : index
    %c0_20 = arith.constant 0 : index
    %c0_21 = arith.constant 0 : index
    %25 = vector.load %arg16[%c0_19, %c0_20, %c0_21] : memref<1x128x128xf32, #tpu.memory_space<vmem>>, vector<1x128x128xf32>
    %26 = vector.shape_cast %25 : vector<1x128x128xf32> to vector<128x128xf32>
    %27 = vector.shape_cast %24 : vector<128x128xf32> to vector<1x128x128xf32>
    tpu.vector_store %arg16[%c0_19, %c0_20, %c0_21], %27 {strides = array<i32>} : memref<1x128x128xf32, #tpu.memory_space<vmem>>, vector<1x128x128xf32>,
    %28 = arith.truncf %24 : vector<128x128xf32> to vector<128x128xbf16>
    %c0_22 = arith.constant 0 : index
    %c0_23 = arith.constant 0 : index
    %29 = vector.load %arg9[%c0_22, %c0_23] : memref<640x128xbf16, #tpu.memory_space<vmem>>, vector<640x128xbf16>
    %cst_24 = arith.constant dense<0.000000e+00> : vector<640x128xf32>
    %30 = tpu.matmul %29, %28, %cst_24 {dimension_numbers = #tpu.dot_dimension_numbers<[1], [0], [0], [1], [0, 0, 1, 1], [], []>} : vector<640x128xbf16>, vector<128x128xbf16>, vector<640x128xf32> -> vector<640x128xf32>
    %c0_25 = arith.constant 0 : index
    %c0_26 = arith.constant 0 : index
    %31 = vector.load %arg10[%c0_25, %c0_26] : memref<640x1xf32, #tpu.memory_space<vmem>>, vector<640x1xf32>
    %32 = vector.broadcast %31 : vector<640x1xf32> to vector<640x128xf32>
    %33 = arith.addf %30, %32 : vector<640x128xf32>
    %cst_27 = arith.constant 0.000000e+00 : f32
    %34 = vector.broadcast %cst_27 : f32 to vector<640x128xf32>
    %35 = arith.maximumf %33, %34 : vector<640x128xf32>
    %36 = arith.truncf %35 : vector<640x128xf32> to vector<640x128xbf16>
    %37 = vector.extract_strided_slice %36 {offsets = [0, 0], sizes = [128, 128], strides = [1, 1]} : vector<640x128xbf16> to vector<128x128xbf16>
    %c0_28 = arith.constant 0 : index
    %c0_29 = arith.constant 0 : index
    %38 = vector.load %arg11[%c0_28, %c0_29] : memref<128x128xbf16, #tpu.memory_space<vmem>>, vector<128x128xbf16>
    %cst_30 = arith.constant dense<0.000000e+00> : vector<128x128xf32>
    %39 = tpu.matmul %38, %37, %cst_30 {dimension_numbers = #tpu.dot_dimension_numbers<[1], [0], [0], [1], [0, 0, 1, 1], [], []>} : vector<128x128xbf16>, vector<128x128xbf16>, vector<128x128xf32> -> vector<128x128xf32>
    %c0_31 = arith.constant 0 : index
    %c0_32 = arith.constant 0 : index
    %40 = vector.load %arg12[%c0_31, %c0_32] : memref<128x1xf32, #tpu.memory_space<vmem>>, vector<128x1xf32>
    %41 = vector.broadcast %40 : vector<128x1xf32> to vector<128x128xf32>
    %42 = arith.addf %39, %41 : vector<128x128xf32>
    %cst_33 = arith.constant 0.000000e+00 : f32
    %43 = vector.broadcast %cst_33 : f32 to vector<128x128xf32>
    %44 = arith.maximumf %42, %43 : vector<128x128xf32>
    %45 = arith.truncf %44 : vector<128x128xf32> to vector<128x128xbf16>
    %c0_34 = arith.constant 0 : index
    %c0_35 = arith.constant 0 : index
    %46 = vector.load %arg13[%c0_34, %c0_35] : memref<40x128xbf16, #tpu.memory_space<vmem>>, vector<40x128xbf16>
    %cst_36 = arith.constant dense<0.000000e+00> : vector<40x128xf32>
    %47 = tpu.matmul %46, %45, %cst_36 {dimension_numbers = #tpu.dot_dimension_numbers<[1], [0], [0], [1], [0, 0, 1, 1], [], []>} : vector<40x128xbf16>, vector<128x128xbf16>, vector<40x128xf32> -> vector<40x128xf32>
    %c0_37 = arith.constant 0 : index
    %c0_38 = arith.constant 0 : index
    %48 = vector.load %arg14[%c0_37, %c0_38] : memref<40x512xbf16, #tpu.memory_space<vmem>>, vector<40x512xbf16>
    %49 = vector.extract_strided_slice %36 {offsets = [128, 0], sizes = [512, 128], strides = [1, 1]} : vector<640x128xbf16> to vector<512x128xbf16>
    %cst_39 = arith.constant dense<0.000000e+00> : vector<40x128xf32>
    %50 = tpu.matmul %48, %49, %cst_39 {dimension_numbers = #tpu.dot_dimension_numbers<[1], [0], [0], [1], [0, 0, 1, 1], [], []>} : vector<40x512xbf16>, vector<512x128xbf16>, vector<40x128xf32> -> vector<40x128xf32>
    %51 = arith.addf %47, %50 : vector<40x128xf32>
    %c0_40 = arith.constant 0 : index
    %c0_41 = arith.constant 0 : index
    %52 = vector.load %arg15[%c0_40, %c0_41] : memref<40x1xf32, #tpu.memory_space<vmem>>, vector<40x1xf32>
    %53 = vector.broadcast %52 : vector<40x1xf32> to vector<40x128xf32>
    %54 = arith.addf %51, %53 : vector<40x128xf32>
    %c0_42 = arith.constant 0 : index
    %c0_43 = arith.constant 0 : index
    %c0_44 = arith.constant 0 : index
    %55 = vector.load %arg17[%c0_42, %c0_43, %c0_44] : memref<1x40x128xf32, #tpu.memory_space<vmem>>, vector<1x40x128xf32>
    %56 = vector.shape_cast %55 : vector<1x40x128xf32> to vector<40x128xf32>
    %57 = vector.shape_cast %54 : vector<40x128xf32> to vector<1x40x128xf32>
    tpu.vector_store %arg17[%c0_42, %c0_43, %c0_44], %57 {strides = array<i32>} : memref<1x40x128xf32, #tpu.memory_space<vmem>>, vector<1x40x128xf32>,
    return
  }
  func.func @transform_0(%arg0: i32, %arg1: i32) -> (i32, i32, i32) {
    %c0_i32 = arith.constant 0 : i32
    %c0_i32_0 = arith.constant 0 : i32
    return %arg0, %c0_i32, %arg1 : i32, i32, i32
  }
  func.func @transform_1(%arg0: i32, %arg1: i32) -> (i32, i32) {
    %c0_i32 = arith.constant 0 : i32
    %c0_i32_0 = arith.constant 0 : i32
    %c0_i32_1 = arith.constant 0 : i32
    return %c0_i32, %c0_i32_0 : i32, i32
  }
  func.func @transform_2(%arg0: i32, %arg1: i32) -> (i32, i32) {
    %c0_i32 = arith.constant 0 : i32
    %c0_i32_0 = arith.constant 0 : i32
    %c0_i32_1 = arith.constant 0 : i32
    return %c0_i32, %c0_i32_0 : i32, i32
  }
  func.func @transform_3(%arg0: i32, %arg1: i32) -> (i32, i32) {
    %c0_i32 = arith.constant 0 : i32
    %c0_i32_0 = arith.constant 0 : i32
    %c0_i32_1 = arith.constant 0 : i32
    return %c0_i32, %c0_i32_0 : i32, i32
  }
  func.func @transform_4(%arg0: i32, %arg1: i32) -> (i32, i32) {
    %c0_i32 = arith.constant 0 : i32
    %c0_i32_0 = arith.constant 0 : i32
    %c0_i32_1 = arith.constant 0 : i32
    return %c0_i32, %c0_i32_0 : i32, i32
  }
  func.func @transform_5(%arg0: i32, %arg1: i32) -> (i32, i32) {
    %c0_i32 = arith.constant 0 : i32
    %c0_i32_0 = arith.constant 0 : i32
    %c0_i32_1 = arith.constant 0 : i32
    return %c0_i32, %c0_i32_0 : i32, i32
  }
  func.func @transform_6(%arg0: i32, %arg1: i32) -> (i32, i32) {
    %c0_i32 = arith.constant 0 : i32
    %c0_i32_0 = arith.constant 0 : i32
    %c0_i32_1 = arith.constant 0 : i32
    return %c0_i32, %c0_i32_0 : i32, i32
  }
  func.func @transform_7(%arg0: i32, %arg1: i32) -> (i32, i32) {
    %c0_i32 = arith.constant 0 : i32
    %c0_i32_0 = arith.constant 0 : i32
    %c0_i32_1 = arith.constant 0 : i32
    return %c0_i32, %c0_i32_0 : i32, i32
  }
  func.func @transform_8(%arg0: i32, %arg1: i32) -> (i32, i32) {
    %c0_i32 = arith.constant 0 : i32
    %c0_i32_0 = arith.constant 0 : i32
    %c0_i32_1 = arith.constant 0 : i32
    return %c0_i32, %c0_i32_0 : i32, i32
  }
  func.func @transform_9(%arg0: i32, %arg1: i32) -> (i32, i32) {
    %c0_i32 = arith.constant 0 : i32
    %c0_i32_0 = arith.constant 0 : i32
    %c0_i32_1 = arith.constant 0 : i32
    return %c0_i32, %c0_i32_0 : i32, i32
  }
  func.func @transform_10(%arg0: i32, %arg1: i32) -> (i32, i32) {
    %c0_i32 = arith.constant 0 : i32
    %c0_i32_0 = arith.constant 0 : i32
    %c0_i32_1 = arith.constant 0 : i32
    return %c0_i32, %c0_i32_0 : i32, i32
  }
  func.func @transform_11(%arg0: i32, %arg1: i32) -> (i32, i32) {
    %c0_i32 = arith.constant 0 : i32
    %c0_i32_0 = arith.constant 0 : i32
    %c0_i32_1 = arith.constant 0 : i32
    return %c0_i32, %c0_i32_0 : i32, i32
  }
  func.func @transform_12(%arg0: i32, %arg1: i32) -> (i32, i32) {
    %c0_i32 = arith.constant 0 : i32
    %c0_i32_0 = arith.constant 0 : i32
    %c0_i32_1 = arith.constant 0 : i32
    return %c0_i32, %c0_i32_0 : i32, i32
  }
  func.func @transform_13(%arg0: i32, %arg1: i32) -> (i32, i32) {
    %c0_i32 = arith.constant 0 : i32
    %c0_i32_0 = arith.constant 0 : i32
    %c0_i32_1 = arith.constant 0 : i32
    return %c0_i32, %c0_i32_0 : i32, i32
  }
  func.func @transform_14(%arg0: i32, %arg1: i32) -> (i32, i32, i32) {
    %c0_i32 = arith.constant 0 : i32
    %c0_i32_0 = arith.constant 0 : i32
    return %arg0, %c0_i32, %arg1 : i32, i32, i32
  }
  func.func @transform_15(%arg0: i32, %arg1: i32) -> (i32, i32, i32) {
    %c0_i32 = arith.constant 0 : i32
    %c0_i32_0 = arith.constant 0 : i32
    return %arg0, %c0_i32, %arg1 : i32, i32, i32
  }
}

</mosaic_0001>

<bundles_post_ra>
// kernel: grasp_baseline_forward.1
= control target key start
LH: loop header
LB: loop body
LE: loop exit
PB: predicated region body
PF: predicated region fallthrough
CT: control target
= control target key end

     0   :  { %s4829_s0 = inlined_call_operand.vmem [shape: bf16[2,8,128], index: 0, kind: input, shape index: {}]   ;;  %s4830_s1 = inlined_call_operand.vmem [shape: bf16[32,8], index: 1, kind: input, shape index: {}]   ;;  %s4831_s2 = inlined_call_operand.vmem [shape: f32[32,1], index: 2, kind: input, shape index: {}]   ;;  %s4832_s3 = inlined_call_operand.vmem [shape: bf16[64,32], index: 3, kind: input, shape index: {}]   ;;  %s4833_s4 = inlined_call_operand.vmem [shape: f32[64,1], index: 4, kind: input, shape index: {}]   ;;  %s4834_s5 = inlined_call_operand.vmem [shape: bf16[128,64], index: 5, kind: input, shape index: {}]   ;;  %s4835_s6 = inlined_call_operand.vmem [shape: f32[128,1], index: 6, kind: input, shape index: {}]   ;;  %s4836_s7 = inlined_call_operand.vmem [shape: bf16[640,128], index: 7, kind: input, shape index: {}]   ;;  %s4837_s8 = inlined_call_operand.vmem [shape: f32[640,1], index: 8, kind: input, shape index: {}]   ;;  %s4838_s9 = inlined_call_operand.vmem [shape: bf16[128,128], index: 9, kind: input, shape index: {}]   ;;  %s4839_s10 = inlined_call_operand.vmem [shape: f32[128,1], index: 10, kind: input, shape index: {}]   ;;  %s4840_s11 = inlined_call_operand.vmem [shape: bf16[40,128], index: 11, kind: input, shape index: {}]   ;;  %s4841_s12 = inlined_call_operand.vmem [shape: bf16[40,512], index: 12, kind: input, shape index: {}]   ;;  %s4842_s13 = inlined_call_operand.vmem [shape: f32[40,1], index: 13, kind: input, shape index: {}]   ;;  %s4843_s14 = inlined_call_operand.hbm [shape: f32[2,128,128], index: 14, kind: output, shape index: {0}]   ;;  %s4844_s15 = inlined_call_operand.vmem [shape: f32[2,40,128], index: 15, kind: output, shape index: {1}]  }
   0x1   :  { %4852 = sst [smem:[#allocation38_spill]] %s4844_s15 }
   0x2   :  { %21 = vsyncpa [#allocation3], 0 }
   0x3   :  { %23 = vsyncpa [#allocation3 + $0x1], 0  ;;  %s3666_s18 = smov 0   ;;  %s3668_s19 = smov 0  }
   0x4   :  { %s3670_s20 = smov 0   ;;  %s3672_s21 = smov 0  }
   0x5   :  { %s3674_s22 = smov 0   ;;  %s3676_s23 = smov 0  }
   0x6 LB: > { %4853 = sst [smem:[#allocation5_spill]] %s3561_s18  ;;  %s3029_s24 = sadd.s32 4294967295, %s3581_s23   ;;  %s3581_s23 = sphi %s3676_s23, %s29_s23   ;;  %s3577_s22 = sphi %s3674_s22, %s4921_s22   ;;  %s3573_s21 = sphi %s3672_s21, %s4920_s21   ;;  %s3569_s20 = sphi %s3670_s20, %s4919_s20   ;;  %s3565_s19 = sphi %s3668_s19, %s4923_s19   ;;  %s3561_s18 = sphi %s3666_s18, %s4922_s18  }
   0x7   : > { %4854 = sst [smem:[#allocation6_spill]] %s3569_s20  ;;  %s3030_s25 = sadd.s32 4294967294, %s3581_s23  }
   0x8   : > { %4855 = sst [smem:[#allocation7_spill]] %s3577_s22  ;;  %s41_s26 = sadd.s32 1, %s3577_s22 }
   0x9   : > { %4856 = sst [smem:[#allocation8_spill]] %s3581_s23  ;;  %s351_s27 = sadd.s32 1, %s3569_s20 }
   0xa   : > { %p43_p0 = scmp.ge.s32.totalorder %s41_s26, 2  ;;  %p361_p1 = scmp.ne.s32.totalorder %s3569_s20, %s3565_s19 }
   0xb   : > { %p362_p2 = scmp.eq.s32.totalorder %s3029_s24, 1  ;;  %p367_p3 = scmp.ne.s32.totalorder %s3565_s19, %s3561_s18 }
   0xc   : > { %s4925_s26 = smov (%p43_p0, %s41_s26), 0  ;;  %p368_p5 = scmp.eq.s32.totalorder %s3030_s25, 1 }
   0xd   : > { %4857 = sst [smem:[#allocation9_spill]] %s4925_s26  ;;  %p3706_p4 = por %p362_p2, %p361_p1 }
   0xe   : > { %s346_s29 = ssub.s32 %s3577_s22, %s4925_s26  ;;  %p3033_p6 = scmp.ge.s32.totalorder %s3581_s23, 1 }
   0xf   : > { %p349_p7 = scmp.eq.s32.totalorder %s346_s29, 0  ;;  %p3713_p8 = por %p368_p5, %p367_p3 }
  0x10   : > { %p463_p9 = scmp.lt.s32.totalorder %s3581_s23, 3 }
  0x11   : > { %s4859_s30 = scalar_select %p3713_p8, 1, 0 }
  0x12   : > { %s3719_s16 = scalar_select %p349_p7, %s3569_s20, %s351_s27  }
  0x13   : > { %4860 = sst [smem:[#allocation10_spill]] %s4859_s30  ;;  %p464_p10 = pnand %p3033_p6, %p463_p9 }
  0x14   : > { %4861 = sst [smem:[#allocation11_spill]] %s3719_s16 }
  0x15   : > { %467 = sbr.rel (%p464_p10) target bundleno = 1397 (0x575), region = 76 }
  0x1a   : > { %v626_v0 = vld [vmem:[%s4833_s4 + $0x30] sm:$0xff]  ;;  %v542_v2 = vld [vmem:[%s4831_s2] sm:$0xff]  ;;  %p521_p11 = scmp.lt.s32.totalorder %s3573_s21, 1  ;;  %v3583_v3 = vmov 0   ;;  %vm583_vm0 = vcmask 1043456   ;;  %v627_v6 = vld [vmem:[%s4833_s4 + $0x38] sm:$0xff] }
  0x1b   : > { %v544_v1 = vld [vmem:[%s4831_s2 + $0x10] sm:$0xff]  ;;  %3502 = vset.pattern.permute.xlu2 %v3583_v3  ;;  %3501 = vset.pattern.permute.xlu1 %v3583_v3  ;;  %v545_v7 = vld [vmem:[%s4831_s2 + $0x18] sm:$0xff]  ;;  %v543_v8 = vld [vmem:[%s4831_s2 + $0x8] sm:$0xff]  ;;  %vm576_vm1 = vcmask 64512   ;;  %vm688_vm2 = vcmask 261120   ;;  %vm894_vm3 = vcmask 523264  }
  0x1c   : > { %3500 = vset.pattern.permute.xlu0 %v3583_v3  ;;  %660 = vperm.xlu2 %3502, %v626_v0   ;;  %s3732_s27 = scalar_select %p521_p11, %s3573_s21, 1  ;;  %v3344_v9 = vld [vmem:[%s4830_s1] sm:$0xff]  ;;  %v622_v10 = vld [vmem:[%s4833_s4 + $0x10] sm:$0xff]  ;;  %v625_v12 = vld [vmem:[%s4833_s4 + $0x28] sm:$0xff] }
  0x1d   : > { %558 = vperm.xlu0 %3500, %v544_v1   ;;  %548 = vperm.xlu1 %3501, %v542_v2   ;;  %v624_v11 = vld [vmem:[%s4833_s4 + $0x20] sm:$0xff]  ;;  %v621_v13 = vld [vmem:[%s4833_s4 + $0x8] sm:$0xff]  ;;  %v623_v14 = vld [vmem:[%s4833_s4 + $0x18] sm:$0xff]  ;;  %s508_s18 = sand.u32 1, %s3565_s19   ;;  %s3416_s23 = sshll.u32 %s3573_s21, 7 }
  0x1e   : > { %s3035_s17 = sshll.u32 %s3732_s27, 2  ;;  %v620_v15 = vld [vmem:[%s4833_s4] sm:$0xff]  ;;  %v3345_v16 = vld [vmem:[%s4830_s1 + $0x8] sm:$0xff]  ;;  %v772_v18 = vld [vmem:[%s4835_s6 + $0x70] sm:$0xff]  ;;  %s2891_s16 = scalar_lea.sflag [#allocation3], %s508_s18 }
  0x1f   : > { %s527_s25 = scalar_lea.vmem %s4829_s0, %s3035_s17  ;;  %v770_v17 = vld [vmem:[%s4835_s6 + $0x60] sm:$0xff]  ;;  %v773_v19 = vld [vmem:[%s4835_s6 + $0x78] sm:$0xff]  ;;  %v771_v21 = vld [vmem:[%s4835_s6 + $0x68] sm:$0xff]  ;;  %s2911_s17 = scalar_lea.hbm %s4843_s14, %s3416_s23 }
  0x20   : > { %v537_v4 = vld [vmem:[%s527_s25] sm:$0xf]  ;;  %v769_v20 = vld [vmem:[%s4835_s6 + $0x58] sm:$0xff]  ;;  %v768_v22 = vld [vmem:[%s4835_s6 + $0x50] sm:$0xff]  ;;  %s3034_s25 = sshll.u32 %s508_s18, 7  ;;  %s2914_s22 = sshll.u32 %s2911_s17, 4  ;;  %s2915_s22 = int_to_ptr.hbm [resolvable:$true] %s2914_s22 }
  0x21   : > { %v585_v5 = vsel %vm583_vm0, %v537_v4, 0  ;;  %v764_v23 = vld [vmem:[%s4835_s6 + $0x30] sm:$0xff]  ;;  %v766_v24 = vld [vmem:[%s4835_s6 + $0x40] sm:$0xff]  ;;  %v767_v25 = vld [vmem:[%s4835_s6 + $0x48] sm:$0xff]  ;;  %s4185_s26 = scalar_lea.vmem [#allocation2], %s3034_s25  ;;  %s3517_s20 = sshra.s32 %s2915_s22, 4  ;;  %s3518_s20 = int_to_ptr.hbm [resolvable:$true] %s3517_s20 }
  0x22   : > { %594 = vmatpush.bf16.msra.mxu0 %v585_v5  ;;  %v763_v26 = vld [vmem:[%s4835_s6 + $0x28] sm:$0xff]  ;;  %v765_v27 = vld [vmem:[%s4835_s6 + $0x38] sm:$0xff]  ;;  %v762_v28 = vld [vmem:[%s4835_s6 + $0x20] sm:$0xff]  ;;  %s2912_s24 = sshll.u32 %s4185_s26, 4  ;;  %s3519_s30 = scalar_lea.hbm %s3518_s20, 128  ;;  %s2913_s24 = int_to_ptr.vmem [resolvable:$true] %s2912_s24 }
  0x23   : > { %v758_v29 = vld [vmem:[%s4835_s6] sm:$0xff]  ;;  %v760_v30 = vld [vmem:[%s4835_s6 + $0x10] sm:$0xff]  ;;  %v761_v31 = vld [vmem:[%s4835_s6 + $0x18] sm:$0xff]  ;;  %p3520_p12 = scmp.ne.s32.totalorder %s3518_s20, %s3519_s30  ;;  %s3523_s25 = scalar_lea.hbm %s4843_s14, 256 }
  0x24   : > { %665 = vperm.xlu2 %3502, %v627_v6   ;;  %v1089_v32 = vld [vmem:[%s4837_s8 + $0x8] sm:$0xff]  ;;  %v1088_v34 = vld [vmem:[%s4837_s8] sm:$0xff]  ;;  %v1090_v36 = vld [vmem:[%s4837_s8 + $0x10] sm:$0xff]  ;;  %p3524_p1 = scmp.lt.s32.totalorder %s3518_s20, %s4843_s14  ;;  %p3525_p2 = scmp.lt.s32.totalorder %s3523_s25, %s3519_s30 }
  0x25   : > { %563 = vperm.xlu0 %3500, %v545_v7   ;;  %553 = vperm.xlu1 %3501, %v543_v8   ;;  %v759_v33 = vld [vmem:[%s4835_s6 + $0x8] sm:$0xff]  ;;  %v1092_v35 = vld [vmem:[%s4837_s8 + $0x20] sm:$0xff]  ;;  %v1091_v37 = vld [vmem:[%s4837_s8 + $0x18] sm:$0xff]  ;;  %p3521_p13 = pnand %p3520_p12, %p3706_p4 }
  0x26   : > { %3045 = vmatmul.msk.bf16.vlgmr.msra.gmra.mxu0 %vm576_vm1, %v3344_v9  ;;  %v1095_v38 = vld [vmem:[%s4837_s8 + $0x38] sm:$0xff]  ;;  %v1093_v39 = vld [vmem:[%s4837_s8 + $0x28] sm:$0xff]  ;;  %v1094_v40 = vld [vmem:[%s4837_s8 + $0x30] sm:$0xff]  ;;  %p3526_p3 = por %p3525_p2, %p3524_p1 }
  0x27   : > { %v1098_v41 = vld [vmem:[%s4837_s8 + $0x50] sm:$0xff]  ;;  %v1096_v42 = vld [vmem:[%s4837_s8 + $0x40] sm:$0xff]  ;;  %v1097_v43 = vld [vmem:[%s4837_s8 + $0x48] sm:$0xff]  ;;  %p3522_p0 = pneg %p3521_p13 }
  0x28   : > { %v1101_v44 = vld [vmem:[%s4837_s8 + $0x68] sm:$0xff]  ;;  %v1099_v45 = vld [vmem:[%s4837_s8 + $0x58] sm:$0xff]  ;;  %v1100_v46 = vld [vmem:[%s4837_s8 + $0x60] sm:$0xff] }
  0x29   : > { %v1104_v47 = vld [vmem:[%s4837_s8 + $0x80] sm:$0xff]  ;;  %v1102_v48 = vld [vmem:[%s4837_s8 + $0x70] sm:$0xff]  ;;  %v1103_v49 = vld [vmem:[%s4837_s8 + $0x78] sm:$0xff]  ;;  %p3527_p5 = pnand %p3526_p3, %p3522_p0 }
  0x2a   : > { %v1107_v50 = vld [vmem:[%s4837_s8 + $0x98] sm:$0xff]  ;;  %v1105_v51 = vld [vmem:[%s4837_s8 + $0x88] sm:$0xff]  ;;  %v1106_v52 = vld [vmem:[%s4837_s8 + $0x90] sm:$0xff] }
  0x2b   : > { %v1110_v53 = vld [vmem:[%s4837_s8 + $0xb0] sm:$0xff]  ;;  %v1108_v54 = vld [vmem:[%s4837_s8 + $0xa0] sm:$0xff]  ;;  %v1109_v55 = vld [vmem:[%s4837_s8 + $0xa8] sm:$0xff] }
  0x2c   : > { %640 = vperm.xlu2 %3502, %v622_v10   ;;  %v1113_v56 = vld [vmem:[%s4837_s8 + $0xc8] sm:$0xff]  ;;  %v1111_v57 = vld [vmem:[%s4837_s8 + $0xb8] sm:$0xff]  ;;  %v1112_v58 = vld [vmem:[%s4837_s8 + $0xc0] sm:$0xff] }
  0x2d   : > { %650 = vperm.xlu0 %3500, %v624_v11   ;;  %655 = vperm.xlu1 %3501, %v625_v12   ;;  %v1116_v60 = vld [vmem:[%s4837_s8 + $0xe0] sm:$0xff]  ;;  %v1114_v61 = vld [vmem:[%s4837_s8 + $0xd0] sm:$0xff]  ;;  %v1115_v62 = vld [vmem:[%s4837_s8 + $0xd8] sm:$0xff] }
  0x2e   : > { %v1119_v2 = vld [vmem:[%s4837_s8 + $0xf8] sm:$0xff]  ;;  %v1117_v3 = vld [vmem:[%s4837_s8 + $0xe8] sm:$0xff]  ;;  %v1118_v4 = vld [vmem:[%s4837_s8 + $0xf0] sm:$0xff] }
  0x2f   : > { %v1122_v6 = vld [vmem:[%s4837_s8 + $0x110] sm:$0xff]  ;;  %v1120_v9 = vld [vmem:[%s4837_s8 + $0x100] sm:$0xff]  ;;  %v1121_v10 = vld [vmem:[%s4837_s8 + $0x108] sm:$0xff] }
  0x34   : > { %635 = vperm.xlu2 %3502, %v621_v13  }
  0x35   : > { %645 = vperm.xlu0 %3500, %v623_v14   ;;  %630 = vperm.xlu1 %3501, %v620_v15  }
  0x36   : > { %3046 = vmatmul.msk.bf16.gmra.mxu0 %vm576_vm1, %v3345_v16 }
  0x3c   : > { %836 = vperm.xlu2 %3502, %v770_v17  }
  0x3d   : > { %846 = vperm.xlu0 %3500, %v772_v18   ;;  %851 = vperm.xlu1 %3501, %v773_v19  }
  0x44   : > { %831 = vperm.xlu2 %3502, %v769_v20   ;;  %v1125_v20 = vld [vmem:[%s4837_s8 + $0x128] sm:$0xff] }
  0x45   : > { %841 = vperm.xlu0 %3500, %v771_v21   ;;  %826 = vperm.xlu1 %3501, %v768_v22   ;;  %v1123_v22 = vld [vmem:[%s4837_s8 + $0x118] sm:$0xff] }
  0x4c   : > { %806 = vperm.xlu2 %3502, %v764_v23   ;;  %v1124_v23 = vld [vmem:[%s4837_s8 + $0x120] sm:$0xff] }
  0x4d   : > { %816 = vperm.xlu0 %3500, %v766_v24   ;;  %821 = vperm.xlu1 %3501, %v767_v25   ;;  %v3346_v25 = vld [vmem:[%s4832_s3] sm:$0xff] }
  0x54   : > { %801 = vperm.xlu2 %3502, %v763_v26   ;;  %v1128_v26 = vld [vmem:[%s4837_s8 + $0x140] sm:$0xff] }
  0x55   : > { %811 = vperm.xlu0 %3500, %v765_v27   ;;  %796 = vperm.xlu1 %3501, %v762_v28   ;;  %v1126_v27 = vld [vmem:[%s4837_s8 + $0x130] sm:$0xff]  ;;  %v1127_v28 = vld [vmem:[%s4837_s8 + $0x138] sm:$0xff] }
  0x5c   : > { %776 = vperm.xlu2 %3502, %v758_v29   ;;  %v1131_v29 = vld [vmem:[%s4837_s8 + $0x158] sm:$0xff] }
  0x5d   : > { %786 = vperm.xlu0 %3500, %v760_v30   ;;  %791 = vperm.xlu1 %3501, %v761_v31   ;;  %v1129_v30 = vld [vmem:[%s4837_s8 + $0x148] sm:$0xff]  ;;  %v1130_v31 = vld [vmem:[%s4837_s8 + $0x150] sm:$0xff] }
  0x64   : > { %1175 = vperm.xlu2 %3502, %v1089_v32   ;;  %v3347_v32 = vld [vmem:[%s4832_s3 + $0x8] sm:$0xff] }
  0x65   : > { %781 = vperm.xlu0 %3500, %v759_v33   ;;  %1170 = vperm.xlu1 %3501, %v1088_v34   ;;  %v1134_v33 = vld [vmem:[%s4837_s8 + $0x170] sm:$0xff]  ;;  %v1132_v34 = vld [vmem:[%s4837_s8 + $0x160] sm:$0xff] }
  0x6c   : > { %1190 = vperm.xlu2 %3502, %v1092_v35   ;;  %v1133_v35 = vld [vmem:[%s4837_s8 + $0x168] sm:$0xff] }
  0x6d   : > { %1180 = vperm.xlu0 %3500, %v1090_v36   ;;  %1185 = vperm.xlu1 %3501, %v1091_v37   ;;  %v1137_v36 = vld [vmem:[%s4837_s8 + $0x188] sm:$0xff]  ;;  %v1135_v37 = vld [vmem:[%s4837_s8 + $0x178] sm:$0xff] }
  0x74   : > { %1205 = vperm.xlu2 %3502, %v1095_v38   ;;  %v1136_v38 = vld [vmem:[%s4837_s8 + $0x180] sm:$0xff] }
  0x75   : > { %1195 = vperm.xlu0 %3500, %v1093_v39   ;;  %1200 = vperm.xlu1 %3501, %v1094_v40   ;;  %v3348_v39 = vld [vmem:[%s4832_s3 + $0x10] sm:$0xff]  ;;  %v1140_v40 = vld [vmem:[%s4837_s8 + $0x1a0] sm:$0xff] }
  0x7c   : > { %1220 = vperm.xlu2 %3502, %v1098_v41   ;;  %v1138_v41 = vld [vmem:[%s4837_s8 + $0x190] sm:$0xff] }
  0x7d   : > { %1210 = vperm.xlu0 %3500, %v1096_v42   ;;  %1215 = vperm.xlu1 %3501, %v1097_v43   ;;  %v1139_v42 = vld [vmem:[%s4837_s8 + $0x198] sm:$0xff] }
  0x7e   : > { %v1143_v43 = vld [vmem:[%s4837_s8 + $0x1b8] sm:$0xff] }
  0x84   : > { %1235 = vperm.xlu2 %3502, %v1101_v44   ;;  %v1141_v44 = vld [vmem:[%s4837_s8 + $0x1a8] sm:$0xff] }
  0x85   : > { %1225 = vperm.xlu0 %3500, %v1099_v45   ;;  %1230 = vperm.xlu1 %3501, %v1100_v46   ;;  %v1142_v45 = vld [vmem:[%s4837_s8 + $0x1b0] sm:$0xff]  ;;  %v3349_v46 = vld [vmem:[%s4832_s3 + $0x18] sm:$0xff] }
  0x8c   : > { %1250 = vperm.xlu2 %3502, %v1104_v47   ;;  %v1146_v47 = vld [vmem:[%s4837_s8 + $0x1d0] sm:$0xff] }
  0x8d   : > { %1240 = vperm.xlu0 %3500, %v1102_v48   ;;  %1245 = vperm.xlu1 %3501, %v1103_v49   ;;  %v1144_v48 = vld [vmem:[%s4837_s8 + $0x1c0] sm:$0xff]  ;;  %v1145_v49 = vld [vmem:[%s4837_s8 + $0x1c8] sm:$0xff] }
  0x8f   : > { %v559_v0 = vpop.permute.xlu0 %558  ;;  %v549_v1 = vpop.permute.xlu1 %548 }
  0x94   : > { %1265 = vperm.xlu2 %3502, %v1107_v50   ;;  %v1148_v50 = vld [vmem:[%s4837_s8 + $0x1e0] sm:$0xff] }
  0x95   : > { %1255 = vperm.xlu0 %3500, %v1105_v51   ;;  %1260 = vperm.xlu1 %3501, %v1106_v52   ;;  %v1150_v51 = vld [vmem:[%s4837_s8 + $0x1f0] sm:$0xff]  ;;  %v1151_v52 = vld [vmem:[%s4837_s8 + $0x1f8] sm:$0xff] }
  0x97   : > { %v564_v7 = vpop.permute.xlu0 %563  ;;  %v554_v11 = vpop.permute.xlu1 %553 }
  0x9c   : > { %1280 = vperm.xlu2 %3502, %v1110_v53   ;;  %v1167_v53 = vld [vmem:[%s4837_s8 + $0x278] sm:$0xff] }
  0x9d   : > { %1270 = vperm.xlu0 %3500, %v1108_v54   ;;  %1275 = vperm.xlu1 %3501, %v1109_v55   ;;  %v1149_v54 = vld [vmem:[%s4837_s8 + $0x1e8] sm:$0xff]  ;;  %v1166_v55 = vld [vmem:[%s4837_s8 + $0x270] sm:$0xff] }
  0xa3   : > { %v596_v59 = vpop.f32.mrf.mxu0 }
  0xa4   : > { %1295 = vperm.xlu2 %3502, %v1113_v56   ;;  %v597_v15 = vadd.f32 %v596_v59, %v549_v1  ;;  %v1165_v56 = vld [vmem:[%s4837_s8 + $0x268] sm:$0xff]  ;;  %v1162_v59 = vld [vmem:[%s4837_s8 + $0x250] sm:$0xff] }
  0xa5   : > { %1285 = vperm.xlu0 %3500, %v1111_v57   ;;  %1290 = vperm.xlu1 %3501, %v1112_v58   ;;  %v1147_v57 = vld [vmem:[%s4837_s8 + $0x1d8] sm:$0xff]  ;;  %v1164_v58 = vld [vmem:[%s4837_s8 + $0x260] sm:$0xff]  ;;  %v2203_v1 = vld [vmem:[%s4839_s10 + $0x50] sm:$0xff] }
  0xa6   : > { %v606_v21 = vmax.f32 %v597_v15, 0.0  ;;  %v1154_v15 = vld [vmem:[%s4837_s8 + $0x210] sm:$0xff] }
  0xab   : > { %v598_v63 = vpop.f32.mrf.mxu0 }
  0xac   : > { %1310 = vperm.xlu2 %3502, %v1116_v60   ;;  %v599_v13 = vadd.f32 %v598_v63, %v554_v11  ;;  %v2207_v60 = vld [vmem:[%s4839_s10 + $0x70] sm:$0xff]  ;;  %v1163_v63 = vld [vmem:[%s4837_s8 + $0x258] sm:$0xff]  ;;  %v1157_v11 = vld [vmem:[%s4837_s8 + $0x228] sm:$0xff] }
  0xad   : > { %1300 = vperm.xlu0 %3500, %v1114_v61   ;;  %1305 = vperm.xlu1 %3501, %v1115_v62   ;;  %v2208_v61 = vld [vmem:[%s4839_s10 + $0x78] sm:$0xff]  ;;  %v2206_v62 = vld [vmem:[%s4839_s10 + $0x68] sm:$0xff] }
  0xae   : > { %v607_v18 = vmax.f32 %v599_v13, 0.0 }
  0xb0   : > { %v610_v24 = vpack.c.bf16 %v607_v18, %v606_v21  ;;  %v1153_v18 = vld [vmem:[%s4837_s8 + $0x208] sm:$0xff] }
  0xb3   : > { %v601_v5 = vpop.f32.mrf.mxu0 }
  0xb4   : > { %1325 = vperm.xlu2 %3502, %v1119_v2   ;;  %v602_v8 = vadd.f32 %v601_v5, %v559_v0  ;;  %v2205_v0 = vld [vmem:[%s4839_s10 + $0x60] sm:$0xff]  ;;  %v2204_v5 = vld [vmem:[%s4839_s10 + $0x58] sm:$0xff] }
  0xb5   : > { %1315 = vperm.xlu0 %3500, %v1117_v3   ;;  %1320 = vperm.xlu1 %3501, %v1118_v4   ;;  %v1160_v2 = vld [vmem:[%s4837_s8 + $0x240] sm:$0xff]  ;;  %v1161_v3 = vld [vmem:[%s4837_s8 + $0x248] sm:$0xff]  ;;  %v1159_v4 = vld [vmem:[%s4837_s8 + $0x238] sm:$0xff] }
  0xb6   : > { %v608_v16 = vmax.f32 %v602_v8, 0.0  ;;  %v2201_v8 = vld [vmem:[%s4839_s10 + $0x40] sm:$0xff] }
  0xbb   : > { %v603_v12 = vpop.f32.mrf.mxu0 }
  0xbc   : > { %v604_v14 = vadd.f32 %v603_v12, %v564_v7  ;;  %1340 = vperm.xlu2 %3502, %v1122_v6   ;;  %v1158_v6 = vld [vmem:[%s4837_s8 + $0x230] sm:$0xff]  ;;  %v1156_v7 = vld [vmem:[%s4837_s8 + $0x220] sm:$0xff] }
  0xbd   : > { %1330 = vperm.xlu0 %3500, %v1120_v9   ;;  %1335 = vperm.xlu1 %3501, %v1121_v10   ;;  %v2202_v9 = vld [vmem:[%s4839_s10 + $0x48] sm:$0xff]  ;;  %v2200_v10 = vld [vmem:[%s4839_s10 + $0x38] sm:$0xff]  ;;  %v2199_v12 = vld [vmem:[%s4839_s10 + $0x30] sm:$0xff] }
  0xbe   : > { %v609_v17 = vmax.f32 %v604_v14, 0.0  ;;  %v2197_v14 = vld [vmem:[%s4839_s10 + $0x20] sm:$0xff] }
  0xc0   : > { %v611_v19 = vpack.c.bf16 %v609_v17, %v608_v16  ;;  %v1155_v16 = vld [vmem:[%s4837_s8 + $0x218] sm:$0xff] }
  0xc2   : > { %707 = vmatpush.bf16.msra.mxu1 %v611_v19  ;;  %v2198_v19 = vld [vmem:[%s4839_s10 + $0x28] sm:$0xff] }
  0xc4   : > { %1355 = vperm.xlu2 %3502, %v1125_v20   ;;  %v1152_v20 = vld [vmem:[%s4837_s8 + $0x200] sm:$0xff] }
  0xc5   : > { %1345 = vperm.xlu0 %3500, %v1123_v22   ;;  %1350 = vperm.xlu1 %3501, %v1124_v23   ;;  %v2193_v22 = vld [vmem:[%s4839_s10] sm:$0xff]  ;;  %v2195_v23 = vld [vmem:[%s4839_s10 + $0x10] sm:$0xff] }
  0xc6   : > { %708 = vmatpush.bf16.msra.mxu1 %v610_v24  ;;  %v2196_v24 = vld [vmem:[%s4839_s10 + $0x18] sm:$0xff] }
  0xc9   : > { %3063 = vmatmul.msk.bf16.vlgmr.msra.gmra.mxu1 %vm688_vm2, %v3346_v25 }
  0xcc   : > { %1370 = vperm.xlu2 %3502, %v1128_v26   ;;  %v2851_v26 = vld [vmem:[%s4842_s13 + $0x8] sm:$0xff] }
  0xcd   : > { %1360 = vperm.xlu0 %3500, %v1126_v27   ;;  %1365 = vperm.xlu1 %3501, %v1127_v28   ;;  %v2194_v27 = vld [vmem:[%s4839_s10 + $0x8] sm:$0xff]  ;;  %v2850_v28 = vld [vmem:[%s4842_s13] sm:$0xff] }
  0xd4   : > { %1385 = vperm.xlu2 %3502, %v1131_v29  }
  0xd5   : > { %1375 = vperm.xlu0 %3500, %v1129_v30   ;;  %1380 = vperm.xlu1 %3501, %v1130_v31   ;;  %v661_v30 = vpop.permute.xlu2 %660  ;;  %v2854_v31 = vld [vmem:[%s4842_s13 + $0x20] sm:$0xff] }
  0xd9   : > { %3064 = vmatmul.msk.bf16.gmra.mxu1 %vm688_vm2, %v3347_v32  ;;  %v2852_v32 = vld [vmem:[%s4842_s13 + $0x10] sm:$0xff] }
  0xdc   : > { %1400 = vperm.xlu2 %3502, %v1134_v33   ;;  %v2853_v33 = vld [vmem:[%s4842_s13 + $0x18] sm:$0xff] }
  0xdd   : > { %1390 = vperm.xlu0 %3500, %v1132_v34   ;;  %1395 = vperm.xlu1 %3501, %v1133_v35   ;;  %v666_v35 = vpop.permute.xlu2 %665 }
  0xe4   : > { %1415 = vperm.xlu2 %3502, %v1137_v36  }
  0xe5   : > { %1405 = vperm.xlu0 %3500, %v1135_v37   ;;  %1410 = vperm.xlu1 %3501, %v1136_v38   ;;  %v651_v37 = vpop.permute.xlu0 %650  ;;  %v641_v38 = vpop.permute.xlu2 %640 }
  0xe9   : > { %3065 = vmatmul.msk.bf16.gmra.mxu1 %vm688_vm2, %v3348_v39 }
  0xec   : > { %1430 = vperm.xlu2 %3502, %v1140_v40   ;;  %v656_v40 = vpop.permute.xlu1 %655 }
  0xed   : > { %1420 = vperm.xlu0 %3500, %v1138_v41   ;;  %1425 = vperm.xlu1 %3501, %v1139_v42  }
  0xf4   : > { %1445 = vperm.xlu2 %3502, %v1143_v43  }
  0xf5   : > { %1435 = vperm.xlu0 %3500, %v1141_v44   ;;  %1440 = vperm.xlu1 %3501, %v1142_v45  }
  0xf9   : > { %3066 = vmatmul.msk.bf16.gmra.mxu1 %vm688_vm2, %v3349_v46 }
  0xfc   : > { %1460 = vperm.xlu2 %3502, %v1146_v47   ;;  %v646_v47 = vpop.permute.xlu0 %645 }
  0xfd   : > { %1450 = vperm.xlu0 %3500, %v1144_v48   ;;  %1455 = vperm.xlu1 %3501, %v1145_v49  }
 0x104   : > { %1470 = vperm.xlu2 %3502, %v1148_v50  }
 0x105   : > { %1480 = vperm.xlu0 %3500, %v1150_v51   ;;  %1485 = vperm.xlu1 %3501, %v1151_v52  }
 0x10c   : > { %1565 = vperm.xlu2 %3502, %v1167_v53   ;;  %v636_v53 = vpop.permute.xlu2 %635 }
 0x10d   : > { %1475 = vperm.xlu0 %3500, %v1149_v54   ;;  %1560 = vperm.xlu1 %3501, %v1166_v55  }
 0x114   : > { %1555 = vperm.xlu2 %3502, %v1165_v56  }
 0x115   : > { %1465 = vperm.xlu0 %3500, %v1147_v57   ;;  %1550 = vperm.xlu1 %3501, %v1164_v58   ;;  %v631_v57 = vpop.permute.xlu1 %630 }
 0x11c   : > { %1540 = vperm.xlu2 %3502, %v1162_v59  }
 0x11d   : > { %2281 = vperm.xlu0 %3500, %v2207_v60   ;;  %2286 = vperm.xlu1 %3501, %v2208_v61  }
 0x124   : > { %2276 = vperm.xlu2 %3502, %v2206_v62  }
 0x125   : > { %1545 = vperm.xlu0 %3500, %v1163_v63   ;;  %2271 = vperm.xlu1 %3501, %v2205_v0   ;;  %v3350_v0 = vld [vmem:[%s4834_s5] sm:$0xff] }
 0x12c   : > { %2261 = vperm.xlu2 %3502, %v2203_v1   ;;  %v3351_v1 = vld [vmem:[%s4834_s5 + $0x8] sm:$0xff] }
 0x12d   : > { %1530 = vperm.xlu0 %3500, %v1160_v2   ;;  %1535 = vperm.xlu1 %3501, %v1161_v3   ;;  %v3352_v2 = vld [vmem:[%s4834_s5 + $0x10] sm:$0xff]  ;;  %v3353_v3 = vld [vmem:[%s4834_s5 + $0x18] sm:$0xff] }
 0x134   : > { %1525 = vperm.xlu2 %3502, %v1159_v4   ;;  %v3354_v4 = vld [vmem:[%s4834_s5 + $0x20] sm:$0xff] }
 0x135   : > { %2266 = vperm.xlu0 %3500, %v2204_v5   ;;  %1520 = vperm.xlu1 %3501, %v1158_v6   ;;  %v3355_v5 = vld [vmem:[%s4834_s5 + $0x28] sm:$0xff]  ;;  %v4164_v6 = vpop.permute.xlu0 %846 }
 0x13c   : > { %1510 = vperm.xlu2 %3502, %v1156_v7   ;;  %v4166_v7 = vpop.permute.xlu2 %836 }
 0x13d   : > { %2251 = vperm.xlu0 %3500, %v2201_v8   ;;  %2256 = vperm.xlu1 %3501, %v2202_v9   ;;  %v3356_v8 = vld [vmem:[%s4834_s5 + $0x30] sm:$0xff]  ;;  %v4172_v9 = vpop.permute.xlu0 %841 }
 0x144   : > { %2246 = vperm.xlu2 %3502, %v2200_v10   ;;  %v4174_v10 = vpop.permute.xlu2 %831 }
 0x145   : > { %1515 = vperm.xlu0 %3500, %v1157_v11   ;;  %2241 = vperm.xlu1 %3501, %v2199_v12   ;;  %v3357_v11 = vld [vmem:[%s4834_s5 + $0x38] sm:$0xff]  ;;  %v817_v12 = vpop.permute.xlu0 %816 }
 0x146   : > { %v710_v13 = vpop.f32.mrf.mxu1 }
 0x147   : > { %v711_v58 = vadd.f32 %v710_v13, %v631_v57 }
 0x149   : > { %v730_v62 = vmax.f32 %v711_v58, 0.0 }
 0x14c   : > { %2231 = vperm.xlu2 %3502, %v2197_v14   ;;  %v807_v13 = vpop.permute.xlu2 %806  ;;  %v4180_v14 = vpop.permute.xlu1 %851 }
 0x14d   : > { %1500 = vperm.xlu0 %3500, %v1154_v15   ;;  %1505 = vperm.xlu1 %3501, %v1155_v16   ;;  %v812_v15 = vpop.permute.xlu0 %811 }
 0x14e   : > { %v712_v17 = vpop.f32.mrf.mxu1 }
 0x14f   : > { %v713_v54 = vadd.f32 %v712_v17, %v636_v53 }
 0x151   : > { %v731_v60 = vmax.f32 %v713_v54, 0.0 }
 0x153   : > { %v738_v63 = vpack.c.bf16 %v731_v60, %v730_v62 }
 0x154   : > { %1495 = vperm.xlu2 %3502, %v1153_v18   ;;  %v802_v16 = vpop.permute.xlu2 %801  ;;  %v827_v17 = vpop.permute.xlu1 %826 }
 0x155   : > { %2236 = vperm.xlu0 %3500, %v2198_v19   ;;  %1490 = vperm.xlu1 %3501, %v1152_v20   ;;  %v787_v18 = vpop.permute.xlu0 %786 }
 0x156   : > { %v715_v21 = vpop.f32.mrf.mxu1 }
 0x157   : > { %v716_v51 = vadd.f32 %v715_v21, %v641_v38 }
 0x159   : > { %v732_v59 = vmax.f32 %v716_v51, 0.0 }
 0x15c   : > { %2211 = vperm.xlu2 %3502, %v2193_v22   ;;  %v777_v19 = vpop.permute.xlu2 %776 }
 0x15d   : > { %2221 = vperm.xlu0 %3500, %v2195_v23   ;;  %2226 = vperm.xlu1 %3501, %v2196_v24   ;;  %v822_v23 = vpop.permute.xlu1 %821  ;;  %v782_v24 = vpop.permute.xlu0 %781 }
 0x15e   : > { %v717_v25 = vpop.f32.mrf.mxu1 }
 0x15f   : > { %v718_v48 = vadd.f32 %v717_v25, %v646_v47 }
 0x161   : > { %v733_v55 = vmax.f32 %v718_v48, 0.0 }
 0x163   : > { %v739_v61 = vpack.c.bf16 %v733_v55, %v732_v59 }
 0x164   : > { %2862 = vperm.xlu2 %3502, %v2851_v26  }
 0x165   : > { %2216 = vperm.xlu0 %3500, %v2194_v27   ;;  %2857 = vperm.xlu1 %3501, %v2850_v28  }
 0x166   : > { %v720_v29 = vpop.f32.mrf.mxu1 }
 0x167   : > { %v721_v44 = vadd.f32 %v720_v29, %v651_v37  ;;  %v797_v29 = vpop.permute.xlu1 %796 }
 0x169   : > { %v734_v52 = vmax.f32 %v721_v44, 0.0 }
 0x16c   : > { %2877 = vperm.xlu2 %3502, %v2854_v31  }
 0x16d   : > { %2867 = vperm.xlu0 %3500, %v2852_v32   ;;  %2872 = vperm.xlu1 %3501, %v2853_v33  }
 0x16e   : > { %v722_v34 = vpop.f32.mrf.mxu1 }
 0x16f   : > { %v723_v42 = vadd.f32 %v722_v34, %v656_v40  ;;  %v792_v33 = vpop.permute.xlu1 %791 }
 0x171   : > { %v735_v49 = vmax.f32 %v723_v42, 0.0 }
 0x173   : > { %v740_v56 = vpack.c.bf16 %v735_v49, %v734_v52 }
 0x176   : > { %v725_v36 = vpop.f32.mrf.mxu1 }
 0x177   : > { %v726_v39 = vadd.f32 %v725_v36, %v661_v30 }
 0x179   : > { %v736_v45 = vmax.f32 %v726_v39, 0.0 }
 0x17e   : > { %v727_v41 = vpop.f32.mrf.mxu1 }
 0x17f   : > { %v728_v43 = vadd.f32 %v727_v41, %v666_v35 }
 0x181   : > { %v737_v46 = vmax.f32 %v728_v43, 0.0 }
 0x183   : > { %v741_v50 = vpack.c.bf16 %v737_v46, %v736_v45 }
 0x185   : > { %923 = vmatpush.bf16.msra.mxu2 %v741_v50 }
 0x189   : > { %924 = vmatpush.bf16.msra.mxu2 %v740_v56 }
 0x18d   : > { %925 = vmatpush.bf16.msra.mxu2 %v739_v61 }
 0x191   : > { %926 = vmatpush.bf16.msra.mxu2 %v738_v63 }
 0x194   : > { %3099 = vmatmul.msk.bf16.vlgmr.msra.gmra.mxu2 %vm894_vm3, %v3350_v0 }
 0x1a4   : > { %3100 = vmatmul.msk.bf16.gmra.mxu2 %vm894_vm3, %v3351_v1 }
 0x1b4   : > { %3101 = vmatmul.msk.bf16.gmra.mxu2 %vm894_vm3, %v3352_v2 }
 0x1c4   : > { %3102 = vmatmul.msk.bf16.gmra.mxu2 %vm894_vm3, %v3353_v3 }
 0x1d4   : > { %3103 = vmatmul.msk.bf16.gmra.mxu2 %vm894_vm3, %v3354_v4 }
 0x1e4   : > { %3104 = vmatmul.msk.bf16.gmra.mxu2 %vm894_vm3, %v3355_v5 }
 0x1f4   : > { %3105 = vmatmul.msk.bf16.gmra.mxu2 %vm894_vm3, %v3356_v8 }
 0x204   : > { %3106 = vmatmul.msk.bf16.gmra.mxu2 %vm894_vm3, %v3357_v11 }
 0x217   : > { %v928_v20 = vpop.f32.mrf.mxu2 }
 0x218   : > { %v929_v21 = vadd.f32 %v928_v20, %v777_v19  ;;  %v3379_v19 = vld [vmem:[%s4836_s7 + $0xa8] sm:$0xff]  ;;  %v4229_v20 = vpop.permute.xlu2 %1175 }
 0x21a   : > { %v968_v22 = vmax.f32 %v929_v21, 0.0 }
 0x21c   : > { %984 = vst [vmem:[%s4185_s26] sm:$0xff] %v968_v22 }
 0x21f   : > { %v930_v25 = vpop.f32.mrf.mxu2 }
 0x220   : > { %v931_v26 = vadd.f32 %v930_v25, %v782_v24  ;;  %v3359_v24 = vld [vmem:[%s4836_s7 + $0x8] sm:$0xff] }
 0x221   : > { %v3371_v25 = vld [vmem:[%s4836_s7 + $0x68] sm:$0xff] }
 0x222   : > { %v969_v27 = vmax.f32 %v931_v26, 0.0  ;;  %v3380_v26 = vld [vmem:[%s4836_s7 + $0xb0] sm:$0xff] }
 0x224   : > { %985 = vst [vmem:[%s4185_s26 + $0x8] sm:$0xff] %v969_v27  ;;  %v4189_v28 = vpack.c.bf16 %v969_v27, %v968_v22  ;;  %v4233_v22 = vpop.permute.xlu2 %1190 }
 0x227   : > { %v933_v30 = vpop.f32.mrf.mxu2 }
 0x228   : > { %v934_v31 = vadd.f32 %v933_v30, %v787_v18  ;;  %v3370_v18 = vld [vmem:[%s4836_s7 + $0x60] sm:$0xff] }
 0x22a   : > { %v970_v32 = vmax.f32 %v934_v31, 0.0  ;;  %v3360_v31 = vld [vmem:[%s4836_s7 + $0x10] sm:$0xff] }
 0x22c   : > { %986 = vst [vmem:[%s4185_s26 + $0x10] sm:$0xff] %v970_v32 }
 0x22f   : > { %v935_v34 = vpop.f32.mrf.mxu2 }
 0x230   : > { %v936_v35 = vadd.f32 %v935_v34, %v792_v33  ;;  %v3381_v34 = vld [vmem:[%s4836_s7 + $0xb8] sm:$0xff] }
 0x232   : > { %v971_v36 = vmax.f32 %v936_v35, 0.0 }
 0x234   : > { %987 = vst [vmem:[%s4185_s26 + $0x18] sm:$0xff] %v971_v36  ;;  %v4193_v37 = vpack.c.bf16 %v971_v36, %v970_v32  ;;  %v3372_v32 = vld [vmem:[%s4836_s7 + $0x70] sm:$0xff] }
 0x237   : > { %v938_v38 = vpop.f32.mrf.mxu2 }
 0x238   : > { %v939_v39 = vadd.f32 %v938_v38, %v797_v29 }
 0x23a   : > { %v972_v40 = vmax.f32 %v939_v39, 0.0 }
 0x23c   : > { %988 = vst [vmem:[%s4185_s26 + $0x20] sm:$0xff] %v972_v40 }
 0x23f   : > { %v940_v41 = vpop.f32.mrf.mxu2 }
 0x240   : > { %v941_v42 = vadd.f32 %v940_v41, %v802_v16  ;;  %v3373_v41 = vld [vmem:[%s4836_s7 + $0x78] sm:$0xff] }
 0x242   : > { %v973_v43 = vmax.f32 %v941_v42, 0.0  ;;  %v3382_v42 = vld [vmem:[%s4836_s7 + $0xc0] sm:$0xff] }
 0x244   : > { %989 = vst [vmem:[%s4185_s26 + $0x28] sm:$0xff] %v973_v43  ;;  %v1002_v44 = vpack.c.bf16 %v973_v43, %v972_v40  ;;  %v3361_v40 = vld [vmem:[%s4836_s7 + $0x18] sm:$0xff] }
 0x247   : > { %v943_v45 = vpop.f32.mrf.mxu2 }
 0x248   : > { %v944_v46 = vadd.f32 %v943_v45, %v807_v13 }
 0x24a   : > { %v974_v47 = vmax.f32 %v944_v46, 0.0 }
 0x24c   : > { %990 = vst [vmem:[%s4185_s26 + $0x30] sm:$0xff] %v974_v47 }
 0x24f   : > { %v945_v48 = vpop.f32.mrf.mxu2 }
 0x250   : > { %v946_v49 = vadd.f32 %v945_v48, %v812_v15  ;;  %v3362_v48 = vld [vmem:[%s4836_s7 + $0x20] sm:$0xff] }
 0x252   : > { %v975_v50 = vmax.f32 %v946_v49, 0.0  ;;  %v3374_v49 = vld [vmem:[%s4836_s7 + $0x80] sm:$0xff] }
 0x254   : > { %991 = vst [vmem:[%s4185_s26 + $0x38] sm:$0xff] %v975_v50  ;;  %v1003_v51 = vpack.c.bf16 %v975_v50, %v974_v47  ;;  %v3383_v50 = vld [vmem:[%s4836_s7 + $0xc8] sm:$0xff] }
 0x257   : > { %v948_v52 = vpop.f32.mrf.mxu2 }
 0x258   : > { %v949_v53 = vadd.f32 %v948_v52, %v817_v12 }
 0x25a   : > { %v976_v54 = vmax.f32 %v949_v53, 0.0 }
 0x25c   : > { %992 = vst [vmem:[%s4185_s26 + $0x40] sm:$0xff] %v976_v54 }
 0x25f   : > { %v950_v55 = vpop.f32.mrf.mxu2 }
 0x260   : > { %v951_v56 = vadd.f32 %v950_v55, %v822_v23  ;;  %v4235_v23 = vpop.permute.xlu0 %1180  ;;  %v3363_v55 = vld [vmem:[%s4836_s7 + $0x28] sm:$0xff] }
 0x262   : > { %v977_v57 = vmax.f32 %v951_v56, 0.0  ;;  %v3375_v56 = vld [vmem:[%s4836_s7 + $0x88] sm:$0xff] }
 0x264   : > { %993 = vst [vmem:[%s4185_s26 + $0x48] sm:$0xff] %v977_v57  ;;  %v1004_v58 = vpack.c.bf16 %v977_v57, %v976_v54  ;;  %v3384_v57 = vld [vmem:[%s4836_s7 + $0xd0] sm:$0xff] }
 0x267   : > { %v953_v59 = vpop.f32.mrf.mxu2 }
 0x268   : > { %v954_v60 = vadd.f32 %v953_v59, %v827_v17  ;;  %v4250_v29 = vpop.permute.xlu0 %1195 }
 0x26a   : > { %v978_v61 = vmax.f32 %v954_v60, 0.0 }
 0x26c   : > { %994 = vst [vmem:[%s4185_s26 + $0x50] sm:$0xff] %v978_v61 }
 0x26f   : > { %v955_v62 = vpop.f32.mrf.mxu2 }
 0x270   : > { %v956_v63 = vadd.f32 %v955_v62, %v4174_v10  ;;  %v4265_v35 = vpop.permute.xlu0 %1210 }
 0x272   : > { %v979_v0 = vmax.f32 %v956_v63, 0.0  ;;  %v3364_v63 = vld [vmem:[%s4836_s7 + $0x30] sm:$0xff] }
 0x274   : > { %995 = vst [vmem:[%s4185_s26 + $0x58] sm:$0xff] %v979_v0 }
 0x277   : > { %v958_v1 = vpop.f32.mrf.mxu2 }
 0x278   : > { %v959_v2 = vadd.f32 %v958_v1, %v4166_v7  ;;  %v4271_v38 = vpop.permute.xlu0 %1225  ;;  %v3385_v1 = vld [vmem:[%s4836_s7 + $0xd8] sm:$0xff] }
 0x27a   : > { %v980_v3 = vmax.f32 %v959_v2, 0.0 }
 0x27c   : > { %996 = vst [vmem:[%s4185_s26 + $0x60] sm:$0xff] %v980_v3 }
 0x27f   : > { %v960_v4 = vpop.f32.mrf.mxu2 }
 0x280   : > { %v961_v5 = vadd.f32 %v960_v4, %v4172_v9  ;;  %v1005_v9 = vpack.c.bf16 %v979_v0, %v978_v61  ;;  %v3376_v0 = vld [vmem:[%s4836_s7 + $0x90] sm:$0xff] }
 0x282   : > { %v981_v8 = vmax.f32 %v961_v5, 0.0 }
 0x284   : > { %997 = vst [vmem:[%s4185_s26 + $0x68] sm:$0xff] %v981_v8  ;;  %v1006_v7 = vpack.c.bf16 %v981_v8, %v980_v3  ;;  %v3365_v8 = vld [vmem:[%s4836_s7 + $0x38] sm:$0xff] }
 0x287   : > { %v963_v11 = vpop.f32.mrf.mxu2 }
 0x288   : > { %v964_v12 = vadd.f32 %v963_v11, %v4164_v6  ;;  %v4214_v6 = vpop.permute.xlu1 %1170  ;;  %v3377_v11 = vld [vmem:[%s4836_s7 + $0x98] sm:$0xff] }
 0x28a   : > { %v982_v13 = vmax.f32 %v964_v12, 0.0 }
 0x28c   : > { %998 = vst [vmem:[%s4185_s26 + $0x70] sm:$0xff] %v982_v13 }
 0x28f   : > { %v965_v15 = vpop.f32.mrf.mxu2 }
 0x290   : > { %v966_v10 = vadd.f32 %v965_v15, %v4180_v14  ;;  %v3358_v14 = vld [vmem:[%s4836_s7] sm:$0xff]  ;;  %v4231_v21 = vpop.permute.xlu1 %1185 }
 0x292   : > { %v983_v16 = vmax.f32 %v966_v10, 0.0 }
 0x294   : > { %999 = vst [vmem:[%s4185_s26 + $0x78] sm:$0xff] %v983_v16  ;;  %v1007_v17 = vpack.c.bf16 %v983_v16, %v982_v13  ;;  %v3386_v13 = vld [vmem:[%s4836_s7 + $0xe0] sm:$0xff] }
 0x296   : > { %1808 = vmatpush.bf16.msrb.mxu0 %v1007_v17  ;;  %3417 = vmatpush.bf16.msrb.mxu2 %v1007_v17 }
 0x297   : > { %3418 = vmatpush.bf16.msra.mxu3 %v1007_v17 }
 0x298   : > { %v4246_v27 = vpop.permute.xlu1 %1200 }
 0x29a   : > { %1809 = vmatpush.bf16.msrb.mxu0 %v1006_v7  ;;  %3419 = vmatpush.bf16.msrb.mxu2 %v1006_v7 }
 0x29b   : > { %3420 = vmatpush.bf16.msra.mxu3 %v1006_v7 }
 0x29e   : > { %1810 = vmatpush.bf16.msrb.mxu0 %v1005_v9  ;;  %3421 = vmatpush.bf16.msrb.mxu2 %v1005_v9 }
 0x29f   : > { %3422 = vmatpush.bf16.msra.mxu3 %v1005_v9  ;;  %v3366_v9 = vld [vmem:[%s4836_s7 + $0x40] sm:$0xff] }
 0x2a0   : > { %v4252_v30 = vpop.permute.xlu1 %1215 }
 0x2a2   : > { %1811 = vmatpush.bf16.msrb.mxu0 %v1004_v58  ;;  %3423 = vmatpush.bf16.msrb.mxu2 %v1004_v58 }
 0x2a3   : > { %3424 = vmatpush.bf16.msra.mxu3 %v1004_v58 }
 0x2a6   : > { %1812 = vmatpush.bf16.msrb.mxu0 %v1003_v51  ;;  %3425 = vmatpush.bf16.msrb.mxu2 %v1003_v51 }
 0x2a7   : > { %3426 = vmatpush.bf16.msra.mxu3 %v1003_v51 }
 0x2a8   : > { %v4267_v36 = vpop.permute.xlu1 %1230 }
 0x2aa   : > { %1813 = vmatpush.bf16.msrb.mxu0 %v1002_v44  ;;  %3427 = vmatpush.bf16.msrb.mxu2 %v1002_v44 }
 0x2ab   : > { %3428 = vmatpush.bf16.msra.mxu3 %v1002_v44  ;;  %v4286_v44 = vpop.permute.xlu0 %1240 }
 0x2ae   : > { %1814 = vmatpush.bf16.msrb.mxu0 %v4193_v37  ;;  %3429 = vmatpush.bf16.msrb.mxu2 %v4193_v37 }
 0x2af   : > { %3430 = vmatpush.bf16.msra.mxu3 %v4193_v37 }
 0x2b0   : > { %v4273_v39 = vpop.permute.xlu1 %1245 }
 0x2b2   : > { %1815 = vmatpush.bf16.msrb.mxu0 %v4189_v28  ;;  %3431 = vmatpush.bf16.msrb.mxu2 %v4189_v28 }
 0x2b3   : > { %3432 = vmatpush.bf16.msra.mxu3 %v4189_v28  ;;  %v4248_v28 = vpop.permute.xlu2 %1205  ;;  %v4292_v47 = vpop.permute.xlu0 %1255 }
 0x2b4   : > { %4865 = vst [vmem:[#allocation15_spill] sm:$0xff] %v4292_v47 }
 0x2b5   : > { %1816 = vmatmul.bf16.vlgmr.msrb.gmra.mxu0 %v3358_v14  ;;  %1876 = vmatmul.bf16.vlgmr.msrb.gmra.mxu2 %v3370_v18  ;;  %v3378_v14 = vld [vmem:[%s4836_s7 + $0xa0] sm:$0xff] }
 0x2b6   : > { %1921 = vmatmul.bf16.vlgmr.msra.gmra.mxu3 %v3379_v19  ;;  %v3387_v19 = vld [vmem:[%s4836_s7 + $0xe8] sm:$0xff] }
 0x2b8   : > { %v4288_v45 = vpop.permute.xlu1 %1260 }
 0x2b9   : > { %4863 = vst [vmem:[#allocation13_spill] sm:$0xff] %v4288_v45 }
 0x2bb   : > { %v4260_v33 = vpop.permute.xlu2 %1220  ;;  %v4307_v53 = vpop.permute.xlu0 %1270 }
 0x2bc   : > { %4867 = vst [vmem:[#allocation17_spill] sm:$0xff] %v4307_v53 }
 0x2c0   : > { %v4303_v51 = vpop.permute.xlu1 %1275 }
 0x2c1   : > { %4866 = vst [vmem:[#allocation16_spill] sm:$0xff] %v4303_v51 }
 0x2c3   : > { %v4269_v37 = vpop.permute.xlu2 %1235  ;;  %v4318_v59 = vpop.permute.xlu0 %1285 }
 0x2c4   : > { %4868 = vst [vmem:[#allocation18_spill] sm:$0xff] %v4318_v59 }
 0x2c5   : > { %1821 = vmatmul.bf16.gmra.mxu0 %v3359_v24  ;;  %1881 = vmatmul.bf16.gmra.mxu2 %v3371_v25 }
 0x2c6   : > { %1926 = vmatmul.bf16.gmra.mxu3 %v3380_v26 }
 0x2c8   : > { %v1291_v54 = vpop.permute.xlu1 %1290 }
 0x2cb   : > { %v4284_v43 = vpop.permute.xlu2 %1250  ;;  %v4324_v62 = vpop.permute.xlu0 %1300 }
 0x2cc   : > { %4862 = vst [vmem:[#allocation12_spill] sm:$0xff] %v4284_v43 }
 0x2d0   : > { %v4320_v60 = vpop.permute.xlu1 %1305 }
 0x2d3   : > { %v4290_v46 = vpop.permute.xlu2 %1265  ;;  %v4339_v4 = vpop.permute.xlu0 %1315 }
 0x2d4   : > { %4864 = vst [vmem:[#allocation14_spill] sm:$0xff] %v4290_v46 }
 0x2d5   : > { %1826 = vmatmul.bf16.gmra.mxu0 %v3360_v31  ;;  %1886 = vmatmul.bf16.gmra.mxu2 %v3372_v32 }
 0x2d6   : > { %1931 = vmatmul.bf16.gmra.mxu3 %v3381_v34 }
 0x2d8   : > { %v4335_v2 = vpop.permute.xlu1 %1320 }
 0x2db   : > { %v4305_v52 = vpop.permute.xlu2 %1280  ;;  %v4354_v15 = vpop.permute.xlu0 %1330 }
 0x2e0   : > { %v4341_v5 = vpop.permute.xlu1 %1335 }
 0x2e3   : > { %v1296_v58 = vpop.permute.xlu2 %1295  ;;  %v4360_v17 = vpop.permute.xlu0 %1345 }
 0x2e4   : > { %4872 = vst [vmem:[#allocation22_spill] sm:$0xff] %v4360_v17 }
 0x2e5   : > { %1831 = vmatmul.bf16.gmra.mxu0 %v3361_v40  ;;  %1891 = vmatmul.bf16.gmra.mxu2 %v3373_v41 }
 0x2e6   : > { %1936 = vmatmul.bf16.gmra.mxu3 %v3382_v42 }
 0x2e8   : > { %v4356_v10 = vpop.permute.xlu1 %1350 }
 0x2e9   : > { %4870 = vst [vmem:[#allocation20_spill] sm:$0xff] %v4356_v10 }
 0x2eb   : > { %v4322_v61 = vpop.permute.xlu2 %1310  ;;  %v4377_v25 = vpop.permute.xlu0 %1360 }
 0x2ec   : > { %4875 = vst [vmem:[#allocation25_spill] sm:$0xff] %v4377_v25 }
 0x2f0   : > { %v4362_v7 = vpop.permute.xlu1 %1365 }
 0x2f1   : > { %4873 = vst [vmem:[#allocation23_spill] sm:$0xff] %v4362_v7 }
 0x2f3   : > { %v4337_v3 = vpop.permute.xlu2 %1325 }
 0x2f5   : > { %1836 = vmatmul.bf16.gmra.mxu0 %v3362_v48  ;;  %1896 = vmatmul.bf16.gmra.mxu2 %v3374_v49 }
 0x2f6   : > { %1941 = vmatmul.bf16.gmra.mxu3 %v3383_v50 }
 0x2f8   : > { %v1381_v34 = vpop.permute.xlu1 %1380 }
 0x2fb   : > { %v4349_v12 = vpop.permute.xlu2 %1340 }
 0x2fc   : > { %4869 = vst [vmem:[#allocation19_spill] sm:$0xff] %v4349_v12 }
 0x303   : > { %v4358_v16 = vpop.permute.xlu2 %1355 }
 0x304   : > { %4871 = vst [vmem:[#allocation21_spill] sm:$0xff] %v4358_v16 }
 0x305   : > { %1841 = vmatmul.bf16.gmra.mxu0 %v3363_v55  ;;  %1901 = vmatmul.bf16.gmra.mxu2 %v3375_v56  ;;  %v4381_v55 = vpop.permute.xlu0 %1375 }
 0x306   : > { %1946 = vmatmul.bf16.gmra.mxu3 %v3384_v57  ;;  %4876 = vst [vmem:[#allocation26_spill] sm:$0xff] %v4381_v55 }
 0x30b   : > { %v4375_v24 = vpop.permute.xlu2 %1370 }
 0x30c   : > { %4874 = vst [vmem:[#allocation24_spill] sm:$0xff] %v4375_v24 }
 0x313   : > { %v1386_v48 = vpop.permute.xlu2 %1385 }
 0x315   : > { %1846 = vmatmul.bf16.gmra.mxu0 %v3364_v63  ;;  %1906 = vmatmul.bf16.gmra.mxu2 %v3376_v0  ;;  %v3367_v63 = vld [vmem:[%s4836_s7 + $0x48] sm:$0xff] }
 0x316   : > { %1951 = vmatmul.bf16.gmra.mxu3 %v3385_v1 }
 0x325   : > { %1851 = vmatmul.bf16.gmra.mxu0 %v3365_v8  ;;  %1911 = vmatmul.bf16.gmra.mxu2 %v3377_v11 }
 0x326   : > { %1956 = vmatmul.bf16.gmra.mxu3 %v3386_v13 }
 0x332   : > { %v4370_v18 = vpop.f32.mrf.mxu0 }
 0x335   : > { %1856 = vmatmul.bf16.gmra.mxu0 %v3366_v9  ;;  %1916 = vmatmul.bf16.gmra.mxu2 %v3378_v14 }
 0x336   : > { %1961 = vmatmul.bf16.gmra.mxu3 %v3387_v19 }
 0x338   : > { %v1877_v26 = vpop.f32.mrf.mxu2 }
 0x339   : > { %v1922_v31 = vpop.f32.mrf.mxu3  ;;  %v1878_v40 = vadd.f32 %v1877_v26, %v1291_v54  ;;  %v3388_v54 = vld [vmem:[%s4836_s7 + $0xf0] sm:$0xff] }
 0x33a   : > { %v4379_v32 = vpop.f32.mrf.mxu0  ;;  %v1923_v41 = vadd.f32 %v1922_v31, %v1381_v34 }
 0x33b   : > { %v2041_v42 = vmax.f32 %v1878_v40, 0.0 }
 0x33c   : > { %v2059_v49 = vmax.f32 %v1923_v41, 0.0 }
 0x33d   : > { %v2121_v8 = vpack.c.bf16 %v2041_v42, %v2041_v42  ;;  %v1391_v42 = vpop.permute.xlu0 %1390 }
 0x33e   : > { %v2139_v13 = vpack.c.bf16 %v2059_v49, %v2059_v49 }
 0x340   : > { %v1879_v50 = vpop.f32.mrf.mxu2  ;;  %v2617_v31 = vunpack.c.l.b16 %v2139_v13 }
 0x341   : > { %v1880_v56 = vadd.f32 %v1879_v50, %v1296_v58  ;;  %v1924_v57 = vpop.f32.mrf.mxu3  ;;  %v2599_v58 = vunpack.c.l.b16 %v2121_v8 }
 0x342   : > { %v1925_v0 = vadd.f32 %v1924_v57, %v1386_v48  ;;  %v4386_v1 = vpop.f32.mrf.mxu0 }
 0x343   : > { %v2042_v11 = vmax.f32 %v1880_v56, 0.0 }
 0x344   : > { %v2060_v9 = vmax.f32 %v1925_v0, 0.0 }
 0x345   : > { %v2122_v14 = vpack.c.bf16 %v2042_v11, %v2042_v11  ;;  %1861 = vmatmul.bf16.gmra.mxu0 %v3367_v63 }
 0x346   : > { %v2140_v19 = vpack.c.bf16 %v2060_v9, %v2060_v9  ;;  %1966 = vmatmul.bf16.gmra.mxu3 %v3388_v54  ;;  %v1396_v54 = vpop.permute.xlu1 %1395  ;;  %v3368_v9 = vld [vmem:[%s4836_s7 + $0x50] sm:$0xff] }
 0x347   : > { %v2600_v26 = vunpack.c.l.b16 %v2122_v14 }
 0x348   : > { %v2618_v34 = vunpack.c.l.b16 %v2140_v19  ;;  %v1882_v40 = vpop.f32.mrf.mxu2 }
 0x349   : > { %v1927_v41 = vpop.f32.mrf.mxu3  ;;  %v4391_v48 = vpack.c.b16 %v2600_v26, %v2599_v58  ;;  %v1883_v49 = vadd.f32 %v1882_v40, %v4324_v62  ;;  %v3389_v58 = vld [vmem:[%s4836_s7 + $0xf8] sm:$0xff] }
 0x34a   : > { %v4393_v50 = vpop.f32.mrf.mxu0  ;;  %v4395_v57 = vpack.c.b16 %v2618_v34, %v2617_v31  ;;  %v1928_v56 = vadd.f32 %v1927_v41, %v1391_v42 }
 0x34b   : > { %v2043_v0 = vmax.f32 %v1883_v49, 0.0 }
 0x34c   : > { %4877 = vst [vmem:[#allocation27_spill] sm:$0xff] %v4395_v57  ;;  %v2061_v63 = vmax.f32 %v1928_v56, 0.0  ;;  %v1401_v57 = vpop.permute.xlu2 %1400 }
 0x34d   : > { %v2123_v62 = vpack.c.bf16 %v2043_v0, %v2043_v0 }
 0x34e   : > { %v2141_v31 = vpack.c.bf16 %v2061_v63, %v2061_v63 }
 0x350   : > { %v1884_v11 = vpop.f32.mrf.mxu2  ;;  %v2619_v49 = vunpack.c.l.b16 %v2141_v31 }
 0x351   : > { %v1885_v8 = vadd.f32 %v1884_v11, %v4320_v60  ;;  %v1929_v13 = vpop.f32.mrf.mxu3  ;;  %v2601_v60 = vunpack.c.l.b16 %v2123_v62 }
 0x352   : > { %v1930_v14 = vadd.f32 %v1929_v13, %v1396_v54  ;;  %v4402_v19 = vpop.f32.mrf.mxu0 }
 0x353   : > { %v2044_v26 = vmax.f32 %v1885_v8, 0.0  ;;  %v1411_v8 = vpop.permute.xlu1 %1410 }
 0x354   : > { %v2062_v34 = vmax.f32 %v1930_v14, 0.0 }
 0x355   : > { %v2124_v40 = vpack.c.bf16 %v2044_v26, %v2044_v26  ;;  %1866 = vmatmul.bf16.gmra.mxu0 %v3368_v9  ;;  %v3369_v26 = vld [vmem:[%s4836_s7 + $0x58] sm:$0xff] }
 0x356   : > { %v2142_v41 = vpack.c.bf16 %v2062_v34, %v2062_v34  ;;  %1971 = vmatmul.bf16.gmra.mxu3 %v3389_v58  ;;  %v1406_v58 = vpop.permute.xlu0 %1405 }
 0x357   : > { %v2602_v42 = vunpack.c.l.b16 %v2124_v40  ;;  %v3390_v40 = vld [vmem:[%s4836_s7 + $0x100] sm:$0xff] }
 0x358   : > { %v2620_v56 = vunpack.c.l.b16 %v2142_v41  ;;  %v4407_v11 = vpop.f32.mrf.mxu2  ;;  %v1416_v41 = vpop.permute.xlu2 %1415 }
 0x359   : > { %v1932_v54 = vpop.f32.mrf.mxu3  ;;  %v4409_v13 = vpack.c.b16 %v2602_v42, %v2601_v60 }
 0x35a   : > { %v4411_v12 = vpop.f32.mrf.mxu0  ;;  %v4413_v0 = vpack.c.b16 %v2620_v56, %v2619_v49  ;;  %v1933_v63 = vadd.f32 %v1932_v54, %v1401_v57 }
 0x35c   : > { %4878 = vst [vmem:[#allocation28_spill] sm:$0xff] %v4413_v0  ;;  %v2063_v14 = vmax.f32 %v1933_v63, 0.0  ;;  %v1426_v63 = vpop.permute.xlu1 %1425 }
 0x35e   : > { %v2143_v60 = vpack.c.bf16 %v2063_v14, %v2063_v14 }
 0x360   : > { %v4415_v9 = vpop.f32.mrf.mxu2  ;;  %v2621_v49 = vunpack.c.l.b16 %v2143_v60  ;;  %v1431_v10 = vpop.permute.xlu2 %1430 }
 0x361   : > { %v1934_v62 = vpop.f32.mrf.mxu3 }
 0x362   : > { %v1935_v31 = vadd.f32 %v1934_v62, %v1406_v58  ;;  %v4420_v34 = vpop.f32.mrf.mxu0 }
 0x364   : > { %v2064_v57 = vmax.f32 %v1935_v31, 0.0  ;;  %v1441_v60 = vpop.permute.xlu1 %1440 }
 0x365   : > { %1871 = vmatmul.bf16.gmra.mxu0 %v3369_v26 }
 0x366   : > { %v2144_v42 = vpack.c.bf16 %v2064_v57, %v2064_v57  ;;  %1976 = vmatmul.bf16.gmra.mxu3 %v3390_v40  ;;  %v3391_v40 = vld [vmem:[%s4836_s7 + $0x108] sm:$0xff] }
 0x368   : > { %v2622_v56 = vunpack.c.l.b16 %v2144_v42  ;;  %v4425_v54 = vpop.f32.mrf.mxu2 }
 0x369   : > { %v1937_v17 = vpop.f32.mrf.mxu3 }
 0x36a   : > { %v4427_v0 = vpack.c.b16 %v2622_v56, %v2621_v49  ;;  %v4429_v58 = vpop.f32.mrf.mxu0  ;;  %v1938_v62 = vadd.f32 %v1937_v17, %v1411_v8  ;;  %v1446_v56 = vpop.permute.xlu2 %1445 }
 0x36c   : > { %4879 = vst [vmem:[#allocation29_spill] sm:$0xff] %v4427_v0  ;;  %v2065_v16 = vmax.f32 %v1938_v62, 0.0  ;;  %v4443_v43 = vpop.permute.xlu1 %1455 }
 0x36e   : > { %v2145_v57 = vpack.c.bf16 %v2065_v16, %v2065_v16 }
 0x370   : > { %v4431_v25 = vpop.f32.mrf.mxu2  ;;  %v2623_v0 = vunpack.c.l.b16 %v2145_v57 }
 0x371   : > { %v1939_v14 = vpop.f32.mrf.mxu3 }
 0x372   : > { %v1940_v31 = vadd.f32 %v1939_v14, %v1416_v41  ;;  %v4433_v26 = vpop.f32.mrf.mxu0  ;;  %v1421_v41 = vpop.permute.xlu0 %1420 }
 0x373   : > { %v4446_v57 = vpop.permute.xlu2 %1460 }
 0x374   : > { %v2066_v42 = vmax.f32 %v1940_v31, 0.0 }
 0x376   : > { %v2146_v49 = vpack.c.bf16 %v2066_v42, %v2066_v42  ;;  %1981 = vmatmul.bf16.gmra.mxu3 %v3391_v40 }
 0x378   : > { %v2624_v17 = vunpack.c.l.b16 %v2146_v49  ;;  %v1897_v8 = vpop.f32.mrf.mxu2 }
 0x379   : > { %v1942_v62 = vpop.f32.mrf.mxu3  ;;  %v1898_v14 = vadd.f32 %v1897_v8, %v4354_v15 }
 0x37a   : > { %v4438_v7 = vpop.f32.mrf.mxu0  ;;  %v4440_v24 = vpack.c.b16 %v2624_v17, %v2623_v0  ;;  %v1943_v55 = vadd.f32 %v1942_v62, %v1421_v41  ;;  %v3392_v0 = vld [vmem:[%s4836_s7 + $0x110] sm:$0xff] }
 0x37b   : > { %v2049_v47 = vmax.f32 %v1898_v14, 0.0  ;;  %v4459_v51 = vpop.permute.xlu2 %1470 }
 0x37c   : > { %4880 = vst [vmem:[#allocation30_spill] sm:$0xff] %v4440_v24  ;;  %v2067_v16 = vmax.f32 %v1943_v55, 0.0  ;;  %v4453_v55 = vpop.permute.xlu1 %1485 }
 0x37d   : > { %v2129_v17 = vpack.c.bf16 %v2049_v47, %v2049_v47 }
 0x37e   : > { %v2147_v8 = vpack.c.bf16 %v2067_v16, %v2067_v16  ;;  %v1436_v16 = vpop.permute.xlu0 %1435 }
 0x380   : > { %v1899_v31 = vpop.f32.mrf.mxu2  ;;  %v2625_v24 = vunpack.c.l.b16 %v2147_v8 }
 0x381   : > { %v1900_v40 = vadd.f32 %v1899_v31, %v4341_v5  ;;  %v1944_v42 = vpop.f32.mrf.mxu3  ;;  %v2607_v5 = vunpack.c.l.b16 %v2129_v17  ;;  %v3393_v17 = vld [vmem:[%s4836_s7 + $0x118] sm:$0xff] }
 0x382   : > { %v1945_v49 = vadd.f32 %v1944_v42, %v1426_v63  ;;  %v4448_v45 = vpop.f32.mrf.mxu0 }
 0x383   : > { %v2050_v15 = vmax.f32 %v1900_v40, 0.0 }
 0x384   : > { %v2068_v62 = vmax.f32 %v1945_v49, 0.0  ;;  %v4461_v49 = vpop.permute.xlu1 %1560 }
 0x385   : > { %v2130_v41 = vpack.c.bf16 %v2050_v15, %v2050_v15  ;;  %4883 = vst [vmem:[#allocation33_spill] sm:$0xff] %v4461_v49 }
 0x386   : > { %v2148_v14 = vpack.c.bf16 %v2068_v62, %v2068_v62  ;;  %1986 = vmatmul.bf16.gmra.mxu3 %v3392_v0 }
 0x387   : > { %v2608_v31 = vunpack.c.l.b16 %v2130_v41 }
 0x388   : > { %v2626_v59 = vunpack.c.l.b16 %v2148_v14  ;;  %v4466_v14 = vpop.permute.xlu2 %1565 }
 0x389   : > { %v1947_v63 = vpop.f32.mrf.mxu3  ;;  %v4455_v42 = vpack.c.b16 %v2608_v31, %v2607_v5  ;;  %4884 = vst [vmem:[#allocation34_spill] sm:$0xff] %v4466_v14 }
 0x38a   : > { %v1844_v46 = vpop.f32.mrf.mxu0  ;;  %v4457_v53 = vpack.c.b16 %v2626_v59, %v2625_v24  ;;  %v1948_v47 = vadd.f32 %v1947_v63, %v1431_v10  ;;  %v4468_v24 = vpop.permute.xlu0 %1450 }
 0x38b   : > { %4881 = vst [vmem:[#allocation31_spill] sm:$0xff] %v4455_v42 }
 0x38c   : > { %4882 = vst [vmem:[#allocation32_spill] sm:$0xff] %v4457_v53  ;;  %v2069_v40 = vmax.f32 %v1948_v47, 0.0 }
 0x38e   : > { %v2149_v8 = vpack.c.bf16 %v2069_v40, %v2069_v40 }
 0x390   : > { %v2627_v10 = vunpack.c.l.b16 %v2149_v8  ;;  %v4474_v49 = vpop.permute.xlu2 %1555 }
 0x391   : > { %v1949_v0 = vpop.f32.mrf.mxu3  ;;  %4887 = vst [vmem:[#allocation37_spill] sm:$0xff] %v4474_v49 }
 0x392   : > { %v1950_v15 = vadd.f32 %v1949_v0, %v1436_v16  ;;  %v1847_v62 = vpop.f32.mrf.mxu0  ;;  %v4472_v16 = vpop.permute.xlu1 %1550 }
 0x393   : > { %4886 = vst [vmem:[#allocation36_spill] sm:$0xff] %v4472_v16  ;;  %v4476_v40 = vpop.permute.xlu0 %1480  ;;  %v1848_v16 = vadd.f32 %v1847_v62, %v4267_v36 }
 0x394   : > { %v2070_v41 = vmax.f32 %v1950_v15, 0.0 }
 0x396   : > { %v2150_v59 = vpack.c.bf16 %v2070_v41, %v2070_v41  ;;  %1991 = vmatmul.bf16.gmra.mxu3 %v3393_v17  ;;  %v3394_v17 = vld [vmem:[%s4836_s7 + $0x120] sm:$0xff] }
 0x398   : > { %v2628_v5 = vunpack.c.l.b16 %v2150_v59  ;;  %v4488_v49 = vpop.permute.xlu2 %1540 }
 0x399   : > { %v1952_v31 = vpop.f32.mrf.mxu3 }
 0x39a   : > { %v1849_v63 = vpop.f32.mrf.mxu0  ;;  %v4470_v47 = vpack.c.b16 %v2628_v5, %v2627_v10  ;;  %v1953_v0 = vadd.f32 %v1952_v31, %v1441_v60  ;;  %v4481_v53 = vpop.permute.xlu1 %2286 }
 0x39b   : > { %v1850_v60 = vadd.f32 %v1849_v63, %v4269_v37  ;;  %v1843_v37 = vadd.f32 %v4448_v45, %v4260_v33  ;;  %v2029_v63 = vmax.f32 %v1848_v16, 0.0  ;;  %v1835_v33 = vadd.f32 %v4429_v58, %v4248_v28  ;;  %v4513_v16 = vpop.f32.mrf.mxu2 }
 0x39c   : > { %4885 = vst [vmem:[#allocation35_spill] sm:$0xff] %v4470_v47  ;;  %v2071_v42 = vmax.f32 %v1953_v0, 0.0 }
 0x39e   : > { %v2151_v8 = vpack.c.bf16 %v2071_v42, %v2071_v42 }
 0x3a0   : > { %v2629_v31 = vunpack.c.l.b16 %v2151_v8 }
 0x3a1   : > { %v1954_v15 = vpop.f32.mrf.mxu3 }
 0x3a2   : > { %v1955_v14 = vadd.f32 %v1954_v15, %v1446_v56  ;;  %v1852_v41 = vpop.f32.mrf.mxu0  ;;  %v4498_v8 = vpop.permute.xlu1 %2271 }
 0x3a3   : > { %v1853_v10 = vadd.f32 %v1852_v41, %v4286_v44  ;;  %v1845_v44 = vadd.f32 %v1844_v46, %v4271_v38  ;;  %v2030_v41 = vmax.f32 %v1850_v60, 0.0  ;;  %v1838_v38 = vadd.f32 %v4433_v26, %v4265_v35 }
 0x3a4   : > { %v2072_v59 = vmax.f32 %v1955_v14, 0.0  ;;  %v4492_v14 = vpop.permute.xlu0 %1475  ;;  %v2027_v46 = vmax.f32 %v1843_v37, 0.0  ;;  %v2109_v60 = vpack.c.bf16 %v2029_v63, %v2029_v63  ;;  %v1830_v63 = vadd.f32 %v4411_v12, %v4250_v29 }
 0x3a5   : > { %v2031_v56 = vmax.f32 %v1853_v10, 0.0  ;;  %v2028_v10 = vmax.f32 %v1845_v44, 0.0  ;;  %v4515_v44 = vpop.permute.xlu2 %2276  ;;  %v2025_v28 = vmax.f32 %v1838_v38, 0.0  ;;  %v1825_v29 = vadd.f32 %v4393_v50, %v4231_v21 }
 0x3a6   : > { %v2152_v5 = vpack.c.bf16 %v2072_v59, %v2072_v59  ;;  %1996 = vmatmul.bf16.gmra.mxu3 %v3394_v17  ;;  %v1840_v59 = vadd.f32 %v4438_v7, %v4252_v30  ;;  %v3395_v30 = vld [vmem:[%s4836_s7 + $0x128] sm:$0xff]  ;;  %v2107_v58 = vpack.c.bf16 %v2027_v46, %v2027_v46  ;;  %v2365_v37 = vunpack.c.l.b16 %v2109_v60 }
 0x3a7   : > { %v2111_v36 = vpack.c.bf16 %v2031_v56, %v2031_v56  ;;  %v2108_v56 = vpack.c.bf16 %v2028_v10, %v2028_v10  ;;  %v2022_v46 = vmax.f32 %v1830_v63, 0.0  ;;  %v1820_v21 = vadd.f32 %v4379_v32, %v4229_v20 }
 0x3a8   : > { %v2630_v0 = vunpack.c.l.b16 %v2152_v5  ;;  %v2110_v5 = vpack.c.bf16 %v2030_v41, %v2030_v41  ;;  %v2026_v7 = vmax.f32 %v1840_v59, 0.0  ;;  %v1893_v20 = vadd.f32 %v4425_v54, %v4335_v2 }
 0x3a9   : > { %v4486_v15 = vpop.f32.mrf.mxu3  ;;  %v2364_v59 = vunpack.c.l.b16 %v2108_v56  ;;  %v4535_v56 = vpop.f32.mrf.mxu2  ;;  %v1888_v2 = vadd.f32 %v4407_v11, %v4322_v61 }
 0x3aa   : > { %v1854_v47 = vpop.f32.mrf.mxu0  ;;  %v4490_v42 = vpack.c.b16 %v2630_v0, %v2629_v31  ;;  %v2366_v35 = vunpack.c.l.b16 %v2110_v5  ;;  %v4523_v5 = vpop.permute.xlu1 %1535  ;;  %v2047_v54 = vmax.f32 %v1893_v20, 0.0 }
 0x3ab   : > { %v1855_v17 = vadd.f32 %v1854_v47, %v4273_v39  ;;  %v2367_v39 = vunpack.c.l.b16 %v2111_v36  ;;  %v2024_v36 = vmax.f32 %v1835_v33, 0.0 }
 0x3ac   : > { %v4517_v41 = vpop.permute.xlu0 %1465  ;;  %v2375_v10 = vpack.c.b16 %v2366_v35, %v2365_v37  ;;  %v2127_v61 = vpack.c.bf16 %v2047_v54, %v2047_v54 }
 0x3ad   : > { %v2032_v62 = vmax.f32 %v1855_v17, 0.0  ;;  %v1833_v17 = vadd.f32 %v4420_v34, %v4246_v27  ;;  %v2105_v27 = vpack.c.bf16 %v2025_v28, %v2025_v28  ;;  %v2363_v34 = vunpack.c.l.b16 %v2107_v58  ;;  %v4537_v35 = vpop.permute.xlu2 %2261 }
 0x3ae   : > { %v2104_v60 = vpack.c.bf16 %v2024_v36, %v2024_v36 }
 0x3af   : > { %v2112_v31 = vpack.c.bf16 %v2032_v62, %v2032_v62  ;;  %v2106_v62 = vpack.c.bf16 %v2026_v7, %v2026_v7  ;;  %v2374_v33 = vpack.c.b16 %v2364_v59, %v2363_v34  ;;  %v2361_v7 = vunpack.c.l.b16 %v2105_v27  ;;  %v3396_v59 = vld [vmem:[%s4836_s7 + $0x130] sm:$0xff] }
 0x3b0   : > { %v2360_v28 = vunpack.c.l.b16 %v2104_v60 }
 0x3b1   : > { %v2368_v47 = vunpack.c.l.b16 %v2112_v31  ;;  %v4504_v0 = vpop.f32.mrf.mxu3  ;;  %v1828_v31 = vadd.f32 %v4402_v19, %v4233_v22 }
 0x3b2   : > { %v4508_v45 = vpop.f32.mrf.mxu0 }
 0x3b3   : > { %v2376_v26 = vpack.c.b16 %v2368_v47, %v2367_v39  ;;  %v2023_v39 = vmax.f32 %v1833_v17, 0.0  ;;  %v2362_v47 = vunpack.c.l.b16 %v2106_v62  ;;  %v2021_v22 = vmax.f32 %v1828_v31, 0.0 }
 0x3b4   : > { %v4541_v50 = vpop.permute.xlu0 %2281  ;;  %v2102_v17 = vpack.c.bf16 %v2022_v46, %v2022_v46  ;;  %v1890_v31 = vadd.f32 %v4415_v9, %v4339_v4 }
 0x3b5   : > { %2385 = vmatpush.bf16.msra.mxu0 %v2376_v26  ;;  %3433 = vmatpush.bf16.msrb.mxu1 %v2376_v26  ;;  %v2103_v19 = vpack.c.bf16 %v2023_v39, %v2023_v39  ;;  %v2020_v26 = vmax.f32 %v1825_v29, 0.0  ;;  %v2373_v58 = vpack.c.b16 %v2362_v47, %v2361_v7  ;;  %v2101_v63 = vpack.c.bf16 %v2021_v22, %v2021_v22  ;;  %v4562_v47 = vpop.f32.mrf.mxu2 }
 0x3b6   : > { %2001 = vmatmul.bf16.gmra.mxu3 %v3395_v30  ;;  %v1823_v30 = vadd.f32 %v4386_v1, %v4235_v23  ;;  %v1895_v23 = vadd.f32 %v4431_v25, %v4337_v3  ;;  %v1818_v1 = vadd.f32 %v4370_v18, %v4214_v6  ;;  %v4556_v3 = vpop.permute.xlu1 %1520  ;;  %v2018_v25 = vmax.f32 %v1820_v21, 0.0 }
 0x3b7   : > { %v2359_v36 = vunpack.c.l.b16 %v2103_v19  ;;  %v2100_v6 = vpack.c.bf16 %v2020_v26, %v2020_v26  ;;  %v2358_v18 = vunpack.c.l.b16 %v2102_v17  ;;  %v2357_v29 = vunpack.c.l.b16 %v2101_v63 }
 0x3b8   : > { %v2019_v37 = vmax.f32 %v1823_v30, 0.0  ;;  %v2048_v39 = vmax.f32 %v1895_v23, 0.0  ;;  %v2017_v27 = vmax.f32 %v1818_v1, 0.0  ;;  %v2098_v46 = vpack.c.bf16 %v2018_v25, %v2018_v25  ;;  %v4564_v30 = vpop.permute.xlu2 %1525 }
 0x3b9   : > { %v4527_v38 = vpop.f32.mrf.mxu3  ;;  %2386 = vmatpush.bf16.msra.mxu0 %v2375_v10  ;;  %3434 = vmatpush.bf16.msrb.mxu1 %v2375_v10  ;;  %v2372_v10 = vpack.c.b16 %v2360_v28, %v2359_v36  ;;  %v2356_v60 = vunpack.c.l.b16 %v2100_v6  ;;  %v2046_v22 = vmax.f32 %v1890_v31, 0.0  ;;  %v2045_v26 = vmax.f32 %v1888_v2, 0.0  ;;  %v3398_v6 = vld [vmem:[%s4838_s9] sm:$0xff] }
 0x3ba   : > { %v4531_v12 = vpop.f32.mrf.mxu0  ;;  %v2099_v34 = vpack.c.bf16 %v2019_v37, %v2019_v37  ;;  %v2128_v4 = vpack.c.bf16 %v2048_v39, %v2048_v39  ;;  %v2097_v19 = vpack.c.bf16 %v2017_v27, %v2017_v27  ;;  %v2354_v17 = vunpack.c.l.b16 %v2098_v46 }
 0x3bb   : > { %v2125_v63 = vpack.c.bf16 %v2045_v26, %v2045_v26  ;;  %v2605_v36 = vunpack.c.l.b16 %v2127_v61 }
 0x3bc   : > { %v4566_v9 = vpop.permute.xlu0 %1545  ;;  %v2355_v7 = vunpack.c.l.b16 %v2099_v34  ;;  %v2606_v23 = vunpack.c.l.b16 %v2128_v4  ;;  %v2353_v37 = vunpack.c.l.b16 %v2097_v19 }
 0x3bd   : > { %2387 = vmatpush.bf16.msra.mxu0 %v2374_v33  ;;  %3435 = vmatpush.bf16.msrb.mxu1 %v2374_v33  ;;  %v2371_v33 = vpack.c.b16 %v2358_v18, %v2357_v29  ;;  %v3400_v18 = vld [vmem:[%s4838_s9 + $0x10] sm:$0xff]  ;;  %v2603_v27 = vunpack.c.l.b16 %v2125_v63  ;;  %v3397_v29 = vld [vmem:[%s4836_s7 + $0x138] sm:$0xff] }
 0x3be   : > { %v2370_v28 = vpack.c.b16 %v2356_v60, %v2355_v7  ;;  %v4570_v1 = vpop.permute.xlu1 %2256  ;;  %v2369_v20 = vpack.c.b16 %v2354_v17, %v2353_v37  ;;  %v2662_v25 = vpack.c.b16 %v2606_v23, %v2605_v36 }
 0x3c0   : > { %v4580_v39 = vpop.permute.xlu2 %1510 }
 0x3c1   : > { %v4547_v62 = vpop.f32.mrf.mxu3  ;;  %2388 = vmatpush.bf16.msra.mxu0 %v2373_v58  ;;  %3436 = vmatpush.bf16.msrb.mxu1 %v2373_v58  ;;  %v2126_v58 = vpack.c.bf16 %v2046_v22, %v2046_v22 }
 0x3c2   : > { %v4551_v32 = vpop.f32.mrf.mxu0  ;;  %v1965_v23 = vadd.f32 %v4547_v62, %v4517_v41  ;;  %v1960_v41 = vadd.f32 %v4504_v0, %v4443_v43 }
 0x3c4   : > { %v4585_v2 = vpop.permute.xlu0 %1530  ;;  %v2076_v62 = vmax.f32 %v1965_v23, 0.0  ;;  %v4890_v23 = vld [vmem:[#allocation14_spill] sm:$0xff] }
 0x3c5   : > { %2389 = vmatpush.bf16.msra.mxu0 %v2372_v10  ;;  %3437 = vmatpush.bf16.msrb.mxu1 %v2372_v10  ;;  %v4578_v10 = vpop.f32.mrf.mxu2 }
 0x3c6   : > { %2006 = vmatmul.bf16.gmra.mxu3 %v3396_v59  ;;  %v2604_v59 = vunpack.c.l.b16 %v2126_v58  ;;  %v4587_v46 = vpop.permute.xlu1 %2241  ;;  %v2156_v43 = vpack.c.bf16 %v2076_v62, %v2076_v62 }
 0x3c8   : > { %v2661_v54 = vpack.c.b16 %v2604_v59, %v2603_v27  ;;  %v4592_v4 = vpop.permute.xlu2 %2246 }
 0x3c9   : > { %v1967_v21 = vpop.f32.mrf.mxu3  ;;  %2390 = vmatpush.bf16.msra.mxu0 %v2371_v33  ;;  %3438 = vmatpush.bf16.msrb.mxu1 %v2371_v33 }
 0x3ca   : > { %v4568_v11 = vpop.f32.mrf.mxu0  ;;  %v1968_v61 = vadd.f32 %v1967_v21, %v4459_v51  ;;  %v1963_v51 = vadd.f32 %v4527_v38, %v4446_v57  ;;  %v1958_v57 = vadd.f32 %v4486_v15, %v4468_v24  ;;  %v4888_v38 = vld [vmem:[#allocation16_spill] sm:$0xff]  ;;  %v4891_v15 = vld [vmem:[#allocation18_spill] sm:$0xff] }
 0x3cc   : > { %v4595_v7 = vpop.permute.xlu0 %2266  ;;  %v2077_v21 = vmax.f32 %v1968_v61, 0.0  ;;  %v2075_v27 = vmax.f32 %v1963_v51, 0.0 }
 0x3cd   : > { %2391 = vmatpush.bf16.msra.mxu0 %v2370_v28  ;;  %3439 = vmatpush.bf16.msrb.mxu1 %v2370_v28  ;;  %v4590_v22 = vpop.f32.mrf.mxu2  ;;  %v3399_v28 = vld [vmem:[%s4838_s9 + $0x8] sm:$0xff] }
 0x3ce   : > { %v4606_v58 = vpop.permute.xlu1 %1505 }
 0x3d1   : > { %v1969_v31 = vpop.f32.mrf.mxu3  ;;  %2392 = vmatpush.bf16.msra.mxu0 %v2369_v20  ;;  %3440 = vmatpush.bf16.msrb.mxu1 %v2369_v20 }
 0x3d2   : > { %v1867_v34 = vpop.f32.mrf.mxu0  ;;  %v1970_v26 = vadd.f32 %v1969_v31, %v4492_v14 }
 0x3d4   : > { %2393 = vmatmul.bf16.vlgmr.msra.gmra.mxu0 %v3398_v6  ;;  %2403 = vmatmul.bf16.vlgmr.msrb.gmra.mxu1 %v3400_v18  ;;  %v2078_v14 = vmax.f32 %v1970_v26, 0.0  ;;  %v4620_v18 = vpop.permute.xlu0 %2251 }
 0x3d5   : > { %2719 = vmatpush.bf16.msra.mxu1 %v2662_v25  ;;  %v4613_v20 = vpop.f32.mrf.mxu2  ;;  %v4616_v25 = vpop.permute.xlu2 %2231 }
 0x3d6   : > { %2011 = vmatmul.bf16.gmra.mxu3 %v3397_v29  ;;  %v2157_v29 = vpack.c.bf16 %v2077_v21, %v2077_v21 }
 0x3d8   : > { %v2635_v51 = vunpack.c.l.b16 %v2157_v29 }
 0x3d9   : > { %2720 = vmatpush.bf16.msra.mxu1 %v2661_v54  ;;  %v1972_v60 = vpop.f32.mrf.mxu3 }
 0x3da   : > { %v1869_v33 = vpop.f32.mrf.mxu0  ;;  %v1973_v19 = vadd.f32 %v1972_v60, %v4476_v40 }
 0x3db   : > { %v1870_v31 = vadd.f32 %v1869_v33, %v4888_v38 }
 0x3dc   : > { %v2079_v17 = vmax.f32 %v1973_v19, 0.0 }
 0x3dd   : > { %2721 = vmatpush.bf16.msra.mxu1 %v4409_v13  ;;  %v3401_v13 = vld [vmem:[%s4838_s9 + $0x18] sm:$0xff]  ;;  %v2038_v24 = vmax.f32 %v1870_v31, 0.0  ;;  %v1917_v38 = vpop.f32.mrf.mxu2 }
 0x3de   : > { %v2159_v63 = vpack.c.bf16 %v2079_v17, %v2079_v17  ;;  %v2074_v17 = vmax.f32 %v1960_v41, 0.0 }
 0x3e0   : > { %v2637_v54 = vunpack.c.l.b16 %v2159_v63  ;;  %v2154_v62 = vpack.c.bf16 %v2074_v17, %v2074_v17 }
 0x3e1   : > { %2722 = vmatpush.bf16.msra.mxu1 %v4391_v48  ;;  %v1974_v40 = vpop.f32.mrf.mxu3 }
 0x3e2   : > { %v1975_v48 = vadd.f32 %v1974_v40, %v4453_v55  ;;  %v1872_v37 = vpop.f32.mrf.mxu0  ;;  %v2158_v55 = vpack.c.bf16 %v2078_v14, %v2078_v14  ;;  %v1491_v40 = vpop.permute.xlu1 %1490  ;;  %v1865_v14 = vadd.f32 %v4568_v11, %v4890_v23 }
 0x3e3   : > { %v1873_v59 = vadd.f32 %v1872_v37, %v4305_v52  ;;  %v4889_v52 = vld [vmem:[#allocation17_spill] sm:$0xff]  ;;  %v2155_v37 = vpack.c.bf16 %v2075_v27, %v2075_v27  ;;  %v1496_v27 = vpop.permute.xlu2 %1495 }
 0x3e4   : > { %v2080_v36 = vmax.f32 %v1975_v48, 0.0  ;;  %2398 = vmatmul.bf16.gmra.mxu0 %v3399_v28  ;;  %2408 = vmatmul.bf16.gmra.mxu1 %v3401_v13  ;;  %v1868_v19 = vadd.f32 %v1867_v34, %v4889_v52  ;;  %v2636_v0 = vunpack.c.l.b16 %v2158_v55  ;;  %v2073_v48 = vmax.f32 %v1958_v57, 0.0  ;;  %v4892_v34 = vld [vmem:[#allocation13_spill] sm:$0xff]  ;;  %v4894_v52 = vld [vmem:[#allocation12_spill] sm:$0xff] }
 0x3e5   : > { %v2039_v26 = vmax.f32 %v1873_v59, 0.0  ;;  %v1863_v63 = vadd.f32 %v4551_v32, %v4892_v34  ;;  %v2634_v55 = vunpack.c.l.b16 %v2156_v43  ;;  %v2036_v31 = vmax.f32 %v1865_v14, 0.0 }
 0x3e6   : > { %v2160_v6 = vpack.c.bf16 %v2080_v36, %v2080_v36  ;;  %v2037_v36 = vmax.f32 %v1868_v19, 0.0  ;;  %v2153_v29 = vpack.c.bf16 %v2073_v48, %v2073_v48  ;;  %v3402_v19 = vld [vmem:[%s4838_s9 + $0x20] sm:$0xff] }
 0x3e7   : > { %v2119_v59 = vpack.c.bf16 %v2039_v26, %v2039_v26  ;;  %v4638_v26 = vpop.permute.xlu0 %1515  ;;  %v2035_v17 = vmax.f32 %v1863_v63, 0.0 }
 0x3e8   : > { %v2638_v60 = vunpack.c.l.b16 %v2160_v6  ;;  %v2677_v6 = vpack.c.b16 %v2636_v0, %v2635_v51  ;;  %v2117_v43 = vpack.c.bf16 %v2037_v36, %v2037_v36  ;;  %v2631_v48 = vunpack.c.l.b16 %v2153_v29 }
 0x3e9   : > { %v1977_v61 = vpop.f32.mrf.mxu3  ;;  %v2115_v34 = vpack.c.bf16 %v2035_v17, %v2035_v17 }
 0x3ea   : > { %v2678_v28 = vpack.c.b16 %v2638_v60, %v2637_v54  ;;  %v1874_v13 = vpop.f32.mrf.mxu0  ;;  %v1978_v21 = vadd.f32 %v1977_v61, %v1491_v40  ;;  %v4893_v54 = vld [vmem:[#allocation15_spill] sm:$0xff]  ;;  %v2118_v60 = vpack.c.bf16 %v2038_v24, %v2038_v24  ;;  %v1858_v61 = vadd.f32 %v4508_v45, %v4894_v52 }
 0x3eb   : > { %v1875_v33 = vadd.f32 %v1874_v13, %v4891_v15  ;;  %v1860_v11 = vadd.f32 %v4531_v12, %v4893_v54  ;;  %v2597_v12 = vunpack.c.l.b16 %v2119_v59  ;;  %v2632_v40 = vunpack.c.l.b16 %v2154_v62 }
 0x3ec   : > { %2765 = vmatpush.bf16.msra.mxu2 %v2678_v28  ;;  %v2633_v28 = vunpack.c.l.b16 %v2155_v37  ;;  %v2081_v32 = vmax.f32 %v1978_v21, 0.0  ;;  %v2116_v15 = vpack.c.bf16 %v2036_v31, %v2036_v31  ;;  %v2596_v45 = vunpack.c.l.b16 %v2118_v60  ;;  %v1919_v31 = vpop.f32.mrf.mxu2 }
 0x3ed   : > { %v2040_v41 = vmax.f32 %v1875_v33, 0.0  ;;  %v2034_v24 = vmax.f32 %v1860_v11, 0.0  ;;  %v2033_v21 = vmax.f32 %v1858_v61, 0.0  ;;  %v2675_v36 = vpack.c.b16 %v2632_v40, %v2631_v48 }
 0x3ee   : > { %v2676_v14 = vpack.c.b16 %v2634_v55, %v2633_v28  ;;  %v2161_v37 = vpack.c.bf16 %v2081_v32, %v2081_v32  ;;  %v2593_v60 = vunpack.c.l.b16 %v2115_v34  ;;  %v4895_v28 = vld [vmem:[#allocation26_spill] sm:$0xff] }
 0x3ef   : > { %v2120_v57 = vpack.c.bf16 %v2040_v41, %v2040_v41  ;;  %v2595_v41 = vunpack.c.l.b16 %v2117_v43  ;;  %v2114_v59 = vpack.c.bf16 %v2034_v24, %v2034_v24  ;;  %v2113_v11 = vpack.c.bf16 %v2033_v21, %v2033_v21  ;;  %v1501_v29 = vpop.permute.xlu0 %1500  ;;  %v4896_v43 = vld [vmem:[#allocation24_spill] sm:$0xff]  ;;  %v4898_v24 = vld [vmem:[#allocation35_spill] sm:$0xff] }
 0x3f0   : > { %2766 = vmatpush.bf16.msra.mxu2 %v2677_v6  ;;  %v2594_v6 = vunpack.c.l.b16 %v2116_v15  ;;  %v2639_v54 = vunpack.c.l.b16 %v2161_v37  ;;  %v1920_v32 = vadd.f32 %v1919_v31, %v4895_v28  ;;  %v3403_v15 = vld [vmem:[%s4838_s9 + $0x28] sm:$0xff] }
 0x3f1   : > { %v2598_v0 = vunpack.c.l.b16 %v2120_v57  ;;  %v1979_v13 = vpop.f32.mrf.mxu3  ;;  %v2657_v62 = vpack.c.b16 %v2596_v45, %v2595_v41  ;;  %v2592_v52 = vunpack.c.l.b16 %v2114_v59  ;;  %v2591_v17 = vunpack.c.l.b16 %v2113_v11  ;;  %v4900_v37 = vld [vmem:[#allocation29_spill] sm:$0xff]  ;;  %v4903_v59 = vld [vmem:[#allocation20_spill] sm:$0xff] }
 0x3f2   : > { %v1980_v23 = vadd.f32 %v1979_v13, %v1496_v27  ;;  %v2656_v61 = vpack.c.b16 %v2594_v6, %v2593_v60  ;;  %v4897_v13 = vld [vmem:[#allocation23_spill] sm:$0xff]  ;;  %v1908_v6 = vadd.f32 %v4562_v47, %v4903_v59 }
 0x3f3   : > { %v2658_v33 = vpack.c.b16 %v2598_v0, %v2597_v12  ;;  %v1918_v12 = vadd.f32 %v1917_v38, %v4896_v43  ;;  %v2655_v0 = vpack.c.b16 %v2592_v52, %v2591_v17  ;;  %v1915_v40 = vadd.f32 %v4613_v20, %v4897_v13  ;;  %v4906_v52 = vld [vmem:[#allocation30_spill] sm:$0xff]  ;;  %v4908_v43 = vld [vmem:[#allocation27_spill] sm:$0xff] }
 0x3f4   : > { %v2082_v51 = vmax.f32 %v1980_v23, 0.0  ;;  %2767 = vmatpush.bf16.msra.mxu2 %v2676_v14  ;;  %2413 = vmatmul.bf16.gmra.mxu1 %v3402_v19  ;;  %v2058_v23 = vmax.f32 %v1920_v32, 0.0  ;;  %v2053_v47 = vmax.f32 %v1908_v6, 0.0 }
 0x3f5   : > { %2723 = vmatpush.bf16.msra.mxu1 %v2658_v33  ;;  %v4899_v33 = vld [vmem:[#allocation25_spill] sm:$0xff]  ;;  %v2057_v48 = vmax.f32 %v1918_v12, 0.0  ;;  %v2056_v21 = vmax.f32 %v1915_v40, 0.0 }
 0x3f6   : > { %v2162_v63 = vpack.c.bf16 %v2082_v51, %v2082_v51  ;;  %v4901_v51 = vld [vmem:[#allocation21_spill] sm:$0xff]  ;;  %v2138_v34 = vpack.c.bf16 %v2058_v23, %v2058_v23 }
 0x3f7   : > { %v1910_v20 = vadd.f32 %v4578_v10, %v4901_v51  ;;  %v2136_v10 = vpack.c.bf16 %v2056_v21, %v2056_v21 }
 0x3f8   : > { %v2640_v55 = vunpack.c.l.b16 %v2162_v63  ;;  %2768 = vmatpush.bf16.msra.mxu2 %v2675_v36  ;;  %v4902_v36 = vld [vmem:[#allocation32_spill] sm:$0xff]  ;;  %v2616_v60 = vunpack.c.l.b16 %v2138_v34 }
 0x3f9   : > { %v1982_v57 = vpop.f32.mrf.mxu3  ;;  %2724 = vmatpush.bf16.msra.mxu1 %v2657_v62  ;;  %v2054_v31 = vmax.f32 %v1910_v20, 0.0  ;;  %v2614_v13 = vunpack.c.l.b16 %v2136_v10 }
 0x3fa   : > { %v4640_v27 = vpack.c.b16 %v2640_v55, %v2639_v54  ;;  %v1983_v19 = vadd.f32 %v1982_v57, %v1501_v29  ;;  %v4904_v55 = vld [vmem:[#allocation28_spill] sm:$0xff] }
 0x3fc   : > { %2769 = vmatpush.bf16.msra.mxu2 %v4490_v42  ;;  %v2083_v14 = vmax.f32 %v1983_v19, 0.0  ;;  %v1913_v42 = vadd.f32 %v4590_v22, %v4899_v33  ;;  %v2137_v22 = vpack.c.bf16 %v2057_v48, %v2057_v48  ;;  %v3404_v48 = vld [vmem:[%s4838_s9 + $0x30] sm:$0xff] }
 0x3fd   : > { %2725 = vmatpush.bf16.msra.mxu1 %v2656_v61  ;;  %v4907_v61 = vld [vmem:[#allocation19_spill] sm:$0xff] }
 0x3fe   : > { %v2163_v41 = vpack.c.bf16 %v2083_v14, %v2083_v14  ;;  %v2055_v62 = vmax.f32 %v1913_v42, 0.0  ;;  %v1903_v28 = vadd.f32 %v4513_v16, %v4907_v61  ;;  %v2615_v17 = vunpack.c.l.b16 %v2137_v22 }
 0x400   : > { %2770 = vmatpush.bf16.msra.mxu2 %v4898_v24  ;;  %v2641_v57 = vunpack.c.l.b16 %v2163_v41  ;;  %v2135_v19 = vpack.c.bf16 %v2055_v62, %v2055_v62  ;;  %v2667_v23 = vpack.c.b16 %v2616_v60, %v2615_v17  ;;  %v2051_v14 = vmax.f32 %v1903_v28, 0.0 }
 0x401   : > { %v1984_v45 = vpop.f32.mrf.mxu3  ;;  %2726 = vmatpush.bf16.msra.mxu1 %v2655_v0  ;;  %v2133_v24 = vpack.c.bf16 %v2053_v47, %v2053_v47  ;;  %v3410_v47 = vld [vmem:[%s4841_s12 + $0xc] sm:$0xf0] }
 0x402   : > { %v1985_v38 = vadd.f32 %v1984_v45, %v4606_v58  ;;  %v4905_v58 = vld [vmem:[#allocation22_spill] sm:$0xff] }
 0x403   : > { %v1905_v11 = vadd.f32 %v4535_v56, %v4905_v58  ;;  %v2134_v56 = vpack.c.bf16 %v2054_v31, %v2054_v31  ;;  %v2611_v51 = vunpack.c.l.b16 %v2133_v24  ;;  %v4909_v58 = vld [vmem:[#allocation31_spill] sm:$0xff] }
 0x404   : > { %v2084_v63 = vmax.f32 %v1985_v38, 0.0  ;;  %2771 = vmatpush.bf16.msra.mxu2 %v4902_v36  ;;  %2418 = vmatmul.bf16.gmra.mxu1 %v3403_v15  ;;  %v2613_v15 = vunpack.c.l.b16 %v2135_v19 }
 0x405   : > { %2742 = vmatpush.bf16.msrb.mxu1 %v4900_v37  ;;  %v2052_v0 = vmax.f32 %v1905_v11, 0.0  ;;  %v2612_v16 = vunpack.c.l.b16 %v2134_v56  ;;  %v2131_v37 = vpack.c.bf16 %v2051_v14, %v2051_v14  ;;  %v3405_v11 = vld [vmem:[%s4838_s9 + $0x38] sm:$0xff] }
 0x406   : > { %v2164_v54 = vpack.c.bf16 %v2084_v63, %v2084_v63  ;;  %v2666_v42 = vpack.c.b16 %v2614_v13, %v2613_v15  ;;  %v4705_v15 = vld [vmem:[%s4841_s12 + $0x40] sm:$0xff] }
 0x407   : > { %v2132_v45 = vpack.c.bf16 %v2052_v0, %v2052_v0  ;;  %v2665_v41 = vpack.c.b16 %v2612_v16, %v2611_v51  ;;  %v2609_v63 = vunpack.c.l.b16 %v2131_v37  ;;  %v3414_v0 = vld [vmem:[%s4841_s12 + $0x2c] sm:$0xf0] }
 0x408   : > { %v2642_v29 = vunpack.c.l.b16 %v2164_v54  ;;  %2772 = vmatpush.bf16.msra.mxu2 %v4906_v52 }
 0x409   : > { %2743 = vmatpush.bf16.msrb.mxu1 %v4904_v55  ;;  %v1987_v32 = vpop.f32.mrf.mxu3 }
 0x40a   : > { %v4667_v12 = vpack.c.b16 %v2642_v29, %v2641_v57  ;;  %v1988_v40 = vadd.f32 %v1987_v32, %v4580_v39  ;;  %v2610_v39 = vunpack.c.l.b16 %v2132_v45  ;;  %v2499_v45 = vunpack.c.l.b16 %v4705_v15 }
 0x40c   : > { %v2085_v33 = vmax.f32 %v1988_v40, 0.0  ;;  %v2664_v62 = vpack.c.b16 %v2610_v39, %v2609_v63  ;;  %v3309_v40 = vld [vmem:[%s4841_s12 + $0x8] sm:$0xf]  ;;  %v2511_v16 = vpack.c.b16 %v2499_v45, %v2499_v45 }
 0x40d   : > { %2744 = vmatpush.bf16.msrb.mxu1 %v4908_v43  ;;  %v3317_v43 = vld [vmem:[%s4841_s12 + $0x20] sm:$0xf]  ;;  %v4910_v39 = vld [vmem:[#allocation33_spill] sm:$0xff] }
 0x40e   : > { %v2165_v21 = vpack.c.bf16 %v2085_v33, %v2085_v33  ;;  %v3318_v56 = vor.u32 %v3414_v0, %v3317_v43  ;;  %v4911_v63 = vld [vmem:[#allocation37_spill] sm:$0xff] }
 0x410   : > { %v2643_v59 = vunpack.c.l.b16 %v2165_v21 }
 0x411   : > { %2745 = vmatpush.bf16.msrb.mxu1 %v2667_v23  ;;  %v1989_v38 = vpop.f32.mrf.mxu3  ;;  %v3411_v23 = vld [vmem:[%s4841_s12 + $0x14] sm:$0xf0] }
 0x412   : > { %v1990_v20 = vadd.f32 %v1989_v38, %v4638_v26  ;;  %v3310_v14 = vor.u32 %v3411_v23, %v3309_v40 }
 0x414   : > { %v2086_v34 = vmax.f32 %v1990_v20, 0.0  ;;  %2423 = vmatmul.bf16.gmra.mxu1 %v3404_v48  ;;  %2773 = vmatmul.bf16.vlgmr.msra.gmra.mxu2 %v3310_v14  ;;  %v3415_v48 = vld [vmem:[%s4841_s12 + $0x34] sm:$0xf0] }
 0x415   : > { %2746 = vmatpush.bf16.msrb.mxu1 %v2666_v42  ;;  %v3325_v42 = vld [vmem:[%s4841_s12 + $0x28] sm:$0xf] }
 0x416   : > { %v2166_v36 = vpack.c.bf16 %v2086_v34, %v2086_v34  ;;  %v3326_v37 = vor.u32 %v3415_v48, %v3325_v42  ;;  %v3408_v34 = vld [vmem:[%s4841_s12 + $0x4] sm:$0xf] }
 0x418   : > { %v2644_v6 = vunpack.c.l.b16 %v2166_v36 }
 0x419   : > { %2747 = vmatpush.bf16.msrb.mxu1 %v2665_v41  ;;  %v1992_v22 = vpop.f32.mrf.mxu3  ;;  %v3303_v41 = vld [vmem:[%s4841_s12 + $0x10] sm:$0xf0] }
 0x41a   : > { %v4674_v54 = vpack.c.b16 %v2644_v6, %v2643_v59  ;;  %v1993_v55 = vadd.f32 %v1992_v22, %v4556_v3  ;;  %v3301_v3 = vld [vmem:[%s4841_s12] sm:$0xf]  ;;  %v3306_v22 = vor.u32 %v3408_v34, %v3303_v41 }
 0x41b   : > { %v3302_v19 = vor.u32 %v3410_v47, %v3301_v3  ;;  %v4912_v59 = vld [vmem:[#allocation36_spill] sm:$0xff] }
 0x41c   : > { %v2087_v26 = vmax.f32 %v1993_v55, 0.0 }
 0x41d   : > { %2748 = vmatpush.bf16.msrb.mxu1 %v2664_v62 }
 0x41e   : > { %v2167_v60 = vpack.c.bf16 %v2087_v26, %v2087_v26 }
 0x420   : > { %v2645_v52 = vunpack.c.l.b16 %v2167_v60 }
 0x421   : > { %2749 = vmatpush.bf16.msrb.mxu1 %v4909_v58  ;;  %v1994_v31 = vpop.f32.mrf.mxu3 }
 0x422   : > { %v1995_v10 = vadd.f32 %v1994_v31, %v4564_v30 }
 0x424   : > { %v2088_v57 = vmax.f32 %v1995_v10, 0.0  ;;  %2428 = vmatmul.bf16.gmra.mxu1 %v3405_v11  ;;  %2778 = vmatmul.bf16.gmra.mxu2 %v3326_v37  ;;  %v4913_v11 = vld [vmem:[#allocation34_spill] sm:$0xff] }
 0x426   : > { %v2168_v29 = vpack.c.bf16 %v2088_v57, %v2088_v57 }
 0x428   : > { %v2646_v61 = vunpack.c.l.b16 %v2168_v29 }
 0x429   : > { %v1997_v28 = vpop.f32.mrf.mxu3 }
 0x42a   : > { %v4682_v32 = vpack.c.b16 %v2646_v61, %v2645_v52  ;;  %v1998_v43 = vadd.f32 %v1997_v28, %v4585_v2  ;;  %v3412_v2 = vld [vmem:[%s4841_s12 + $0x24] sm:$0xf]  ;;  %v3319_v28 = vld [vmem:[%s4841_s12 + $0x30] sm:$0xf0] }
 0x431   : > { %v1999_v17 = vpop.f32.mrf.mxu3 }
 0x432   : > { %v2000_v61 = vadd.f32 %v1999_v17, %v4523_v5  ;;  %v2089_v17 = vmax.f32 %v1998_v43, 0.0 }
 0x434   : > { %2727 = vmatmul.bf16.vlgmr.msra.gmra.mxu1 %v3302_v19 }
 0x439   : > { %v2002_v30 = vpop.f32.mrf.mxu3 }
 0x43a   : > { %v2003_v60 = vadd.f32 %v2002_v30, %v4488_v49  ;;  %v2090_v30 = vmax.f32 %v2000_v61, 0.0 }
 0x43c   : > { %v2091_v0 = vmax.f32 %v2003_v60, 0.0  ;;  %v2170_v42 = vpack.c.bf16 %v2090_v30, %v2090_v30 }
 0x43e   : > { %v2648_v34 = vunpack.c.l.b16 %v2170_v42 }
 0x441   : > { %v2004_v13 = vpop.f32.mrf.mxu3 }
 0x442   : > { %v2005_v58 = vadd.f32 %v2004_v13, %v4566_v9  ;;  %v2472_v9 = vld [vmem:[%s4841_s12 + $0x48] sm:$0xff] }
 0x443   : > { %v2501_v49 = vunpack.c.l.b16 %v2472_v9 }
 0x444   : > { %2732 = vmatmul.bf16.gmra.mxu1 %v3318_v56  ;;  %v2092_v3 = vmax.f32 %v2005_v58, 0.0  ;;  %v3409_v58 = vld [vmem:[%s4841_s12 + $0xc] sm:$0xf] }
 0x445   : > { %v2513_v5 = vpack.c.b16 %v2501_v49, %v2501_v49 }
 0x446   : > { %v2172_v23 = vpack.c.bf16 %v2092_v3, %v2092_v3 }
 0x447   : > { %2783 = vmatmul.bf16.gmra.mxu2 %v2513_v5 }
 0x448   : > { %v2650_v48 = vunpack.c.l.b16 %v2172_v23 }
 0x449   : > { %v2007_v24 = vpop.f32.mrf.mxu3 }
 0x44a   : > { %v2008_v6 = vadd.f32 %v2007_v24, %v4912_v59 }
 0x44c   : > { %v2093_v57 = vmax.f32 %v2008_v6, 0.0 }
 0x44e   : > { %v2173_v56 = vpack.c.bf16 %v2093_v57, %v2093_v57 }
 0x451   : > { %v2009_v33 = vpop.f32.mrf.mxu3  ;;  %v4714_v38 = vpop.f32.mrf.mxu1 }
 0x452   : > { %v2010_v36 = vadd.f32 %v2009_v33, %v4911_v63  ;;  %v2651_v33 = vunpack.c.l.b16 %v2173_v56  ;;  %v2394_v57 = vpop.f32.mrf.mxu0 }
 0x454   : > { %2737 = vmatmul.bf16.gmra.mxu1 %v2511_v16  ;;  %v2094_v26 = vmax.f32 %v2010_v36, 0.0  ;;  %v2171_v16 = vpack.c.bf16 %v2091_v0, %v2091_v0 }
 0x456   : > { %v2174_v47 = vpack.c.bf16 %v2094_v26, %v2094_v26  ;;  %v3311_v26 = vld [vmem:[%s4841_s12 + $0x18] sm:$0xf0] }
 0x458   : > { %v2652_v14 = vunpack.c.l.b16 %v2174_v47 }
 0x459   : > { %v2012_v51 = vpop.f32.mrf.mxu3  ;;  %v4716_v20 = vpop.f32.mrf.mxu1 }
 0x45a   : > { %v2013_v21 = vadd.f32 %v2012_v51, %v4910_v39  ;;  %v2685_v37 = vpack.c.b16 %v2652_v14, %v2651_v33  ;;  %v2169_v51 = vpack.c.bf16 %v2089_v17, %v2089_v17  ;;  %v2649_v39 = vunpack.c.l.b16 %v2171_v16  ;;  %v2396_v3 = vpop.f32.mrf.mxu0 }
 0x45c   : > { %v2095_v62 = vmax.f32 %v2013_v21, 0.0  ;;  %v3322_v21 = vor.u32 %v3412_v2, %v3319_v28  ;;  %v2684_v63 = vpack.c.b16 %v2650_v48, %v2649_v39  ;;  %v2647_v36 = vunpack.c.l.b16 %v2169_v51 }
 0x45e   : > { %v2175_v29 = vpack.c.bf16 %v2095_v62, %v2095_v62  ;;  %v2683_v59 = vpack.c.b16 %v2648_v34, %v2647_v36  ;;  %v2500_v62 = vunpack.c.h.b16 %v4705_v15 }
 0x460   : > { %v2653_v13 = vunpack.c.l.b16 %v2175_v29 }
 0x461   : > { %v2014_v55 = vpop.f32.mrf.mxu3  ;;  %v4729_v10 = vpop.f32.mrf.mxu1 }
 0x462   : > { %v2015_v31 = vadd.f32 %v2014_v55, %v4913_v11  ;;  %v3314_v11 = vor.u32 %v3409_v58, %v3311_v26 }
 0x464   : > { %v2096_v52 = vmax.f32 %v2015_v31, 0.0  ;;  %2750 = vmatmul.bf16.vlgmr.msrb.gmra.mxu1 %v3306_v22  ;;  %v2512_v22 = vpack.c.b16 %v2500_v62, %v2500_v62 }
 0x466   : > { %v2176_v19 = vpack.c.bf16 %v2096_v52, %v2096_v52  ;;  %v2502_v52 = vunpack.c.h.b16 %v2472_v9 }
 0x468   : > { %v2654_v40 = vunpack.c.l.b16 %v2176_v19  ;;  %v2514_v61 = vpack.c.b16 %v2502_v52, %v2502_v52  ;;  %v2462_v52 = vld [vmem:[%s4840_s11 + $0x10] sm:$0xf] }
 0x469   : > { %v4737_v45 = vpop.f32.mrf.mxu1 }
 0x46a   : > { %v2686_v24 = vpack.c.b16 %v2654_v40, %v2653_v13  ;;  %v2237_v40 = vpop.permute.xlu0 %2236  ;;  %v2412_v16 = vadd.f32 %v4737_v45, %v4592_v4  ;;  %v2227_v4 = vpop.permute.xlu1 %2226 }
 0x46c   : > { %2788 = vmatpush.bf16.msrb.mxu0 %v2686_v24  ;;  %v2441_v48 = vmax.f32 %v2412_v16, 0.0 }
 0x470   : > { %2789 = vmatpush.bf16.msrb.mxu0 %v2685_v37 }
 0x471   : > { %v2414_v41 = vpop.f32.mrf.mxu1 }
 0x472   : > { %v2415_v17 = vadd.f32 %v2414_v41, %v4620_v18  ;;  %v2222_v2 = vpop.permute.xlu0 %2221  ;;  %v2405_v18 = vadd.f32 %v4714_v38, %v4616_v25 }
 0x474   : > { %2790 = vmatpush.bf16.msrb.mxu0 %v2684_v63  ;;  %2755 = vmatmul.bf16.gmra.mxu1 %v3322_v21  ;;  %v2442_v28 = vmax.f32 %v2415_v17, 0.0  ;;  %v2438_v41 = vmax.f32 %v2405_v18, 0.0 }
 0x478   : > { %2791 = vmatpush.bf16.msrb.mxu0 %v2683_v59 }
 0x479   : > { %v2416_v6 = vpop.f32.mrf.mxu1 }
 0x47c   : > { %2792 = vmatpush.bf16.msrb.mxu0 %v4682_v32 }
 0x480   : > { %2793 = vmatpush.bf16.msrb.mxu0 %v4674_v54  ;;  %v3413_v54 = vld [vmem:[%s4841_s12 + $0x2c] sm:$0xf] }
 0x481   : > { %v2419_v55 = vpop.f32.mrf.mxu1 }
 0x482   : > { %v2420_v9 = vadd.f32 %v2419_v55, %v4537_v35  ;;  %v2410_v35 = vadd.f32 %v4729_v10, %v4587_v46  ;;  %v2217_v46 = vpop.permute.xlu0 %2216 }
 0x483   : > { %v2397_v36 = vadd.f32 %v2396_v3, %v2217_v46 }
 0x484   : > { %2794 = vmatpush.bf16.msrb.mxu0 %v4667_v12  ;;  %2760 = vmatmul.bf16.gmra.mxu1 %v2512_v22  ;;  %v3327_v12 = vld [vmem:[%s4841_s12 + $0x38] sm:$0xf0]  ;;  %v2440_v39 = vmax.f32 %v2410_v35, 0.0 }
 0x485   : > { %v3330_v31 = vor.u32 %v3413_v54, %v3327_v12  ;;  %v2435_v55 = vmax.f32 %v2397_v36, 0.0 }
 0x486   : > { %v2453_v34 = vpack.c.bf16 %v2441_v48, %v2440_v39 }
 0x488   : > { %2795 = vmatpush.bf16.msrb.mxu0 %v4640_v27 }
 0x489   : > { %v2421_v32 = vpop.f32.mrf.mxu1 }
 0x48a   : > { %v2422_v49 = vadd.f32 %v2421_v32, %v4595_v7  ;;  %v3406_v32 = vld [vmem:[%s4840_s11] sm:$0xff] }
 0x48b   : > { %2796 = vmatmul.bf16.vlgmr.msrb.gmra.mxu0 %v3314_v11 }
 0x48c   : > { %v2445_v5 = vmax.f32 %v2422_v49, 0.0 }
 0x491   : > { %v2424_v15 = vpop.f32.mrf.mxu1 }
 0x492   : > { %v2425_v0 = vadd.f32 %v2424_v15, %v4498_v8  ;;  %v2444_v8 = vmax.f32 %v2420_v9, 0.0 }
 0x494   : > { %v2446_v14 = vmax.f32 %v2425_v0, 0.0  ;;  %v2455_v33 = vpack.c.bf16 %v2445_v5, %v2444_v8 }
 0x497   : > { %v2774_v58 = vpop.f32.mrf.mxu2 }
 0x499   : > { %v2426_v60 = vpop.f32.mrf.mxu1 }
 0x49a   : > { %v2427_v19 = vadd.f32 %v2426_v60, %v4515_v44  ;;  %v2417_v44 = vadd.f32 %v2416_v6, %v4570_v1  ;;  %v2407_v1 = vadd.f32 %v4716_v20, %v2237_v40  ;;  %v2212_v6 = vpop.permute.xlu2 %2211 }
 0x49b   : > { %2801 = vmatmul.bf16.gmra.mxu0 %v3330_v31  ;;  %v2395_v62 = vadd.f32 %v2394_v57, %v2212_v6  ;;  %v3407_v31 = vld [vmem:[%s4840_s11 + $0x8] sm:$0xff] }
 0x49c   : > { %v2447_v30 = vmax.f32 %v2427_v19, 0.0  ;;  %v2443_v7 = vmax.f32 %v2417_v44, 0.0  ;;  %v2439_v45 = vmax.f32 %v2407_v1, 0.0 }
 0x49d   : > { %v2434_v38 = vmax.f32 %v2395_v62, 0.0 }
 0x49e   : > { %v2454_v37 = vpack.c.bf16 %v2443_v7, %v2442_v28  ;;  %v2452_v20 = vpack.c.bf16 %v2439_v45, %v2438_v41 }
 0x49f   : > { %v2450_v11 = vpack.c.bf16 %v2435_v55, %v2434_v38  ;;  %v2776_v54 = vpop.f32.mrf.mxu2 }
 0x4a1   : > { %v2429_v29 = vpop.f32.mrf.mxu1 }
 0x4a2   : > { %v2430_v27 = vadd.f32 %v2429_v29, %v4541_v50  ;;  %v2399_v50 = vpop.f32.mrf.mxu0 }
 0x4a3   : > { %v2400_v63 = vadd.f32 %v2399_v50, %v2222_v2 }
 0x4a4   : > { %v2448_v56 = vmax.f32 %v2430_v27, 0.0  ;;  %v2820_v27 = vunpack.c.l.b16 %v2462_v52 }
 0x4a5   : > { %v2436_v22 = vmax.f32 %v2400_v63, 0.0 }
 0x4a7   : > { %v2779_v60 = vpop.f32.mrf.mxu2 }
 0x4a9   : > { %v2431_v47 = vpop.f32.mrf.mxu1 }
 0x4aa   : > { %v2432_v43 = vadd.f32 %v2431_v47, %v4481_v53  ;;  %v2456_v53 = vpack.c.bf16 %v2447_v30, %v2446_v14  ;;  %v2401_v51 = vpop.f32.mrf.mxu0 }
 0x4ab   : > { %2806 = vmatmul.bf16.gmra.mxu0 %v2514_v61  ;;  %v2402_v21 = vadd.f32 %v2401_v51, %v2227_v4 }
 0x4ac   : > { %v2449_v13 = vmax.f32 %v2432_v43, 0.0  ;;  %v2823_v43 = vpack.c.b16 %v2820_v27, %v2820_v27 }
 0x4ad   : > { %v2437_v59 = vmax.f32 %v2402_v21, 0.0 }
 0x4ae   : > { %v2457_v23 = vpack.c.bf16 %v2449_v13, %v2448_v56 }
 0x4af   : > { %v2451_v25 = vpack.c.bf16 %v2437_v59, %v2436_v22  ;;  %v2781_v3 = vpop.f32.mrf.mxu2 }
 0x4b0   : > { %2827 = vmatpush.bf16.msra.mxu1 %v2457_v23 }
 0x4b1   : > { %v2728_v24 = vpop.f32.mrf.mxu1 }
 0x4b4   : > { %2828 = vmatpush.bf16.msra.mxu1 %v2456_v53 }
 0x4b8   : > { %2829 = vmatpush.bf16.msra.mxu1 %v2455_v33 }
 0x4b9   : > { %v2730_v42 = vpop.f32.mrf.mxu1 }
 0x4bc   : > { %2830 = vmatpush.bf16.msra.mxu1 %v2454_v37 }
 0x4c0   : > { %2831 = vmatpush.bf16.msra.mxu1 %v2453_v34 }
 0x4c1   : > { %v2733_v10 = vpop.f32.mrf.mxu1 }
 0x4c4   : > { %2832 = vmatpush.bf16.msra.mxu1 %v2452_v20 }
 0x4c8   : > { %2833 = vmatpush.bf16.msra.mxu1 %v2451_v25 }
 0x4c9   : > { %v2735_v26 = vpop.f32.mrf.mxu1 }
 0x4ca   : > { %v2784_v56 = vpop.f32.mrf.mxu2 }
 0x4cc   : > { %2834 = vmatpush.bf16.msra.mxu1 %v2450_v11 }
 0x4cf   : > { %2835 = vmatmul.bf16.vlgmr.msra.gmra.mxu1 %v3406_v32 }
 0x4d1   : > { %v2738_v15 = vpop.f32.mrf.mxu1 }
 0x4d9   : > { %v2740_v12 = vpop.f32.mrf.mxu1 }
 0x4df   : > { %2840 = vmatmul.bf16.gmra.mxu1 %v3407_v31 }
 0x4e1   : > { %v2751_v57 = vpop.f32.mrf.mxu1 }
 0x4e2   : > { %v2752_v29 = vadd.f32 %v2751_v57, %v2728_v24 }
 0x4e4   : > { %v2775_v61 = vadd.f32 %v2774_v58, %v2752_v29 }
 0x4e9   : > { %v2753_v47 = vpop.f32.mrf.mxu1 }
 0x4ea   : > { %v2754_v19 = vadd.f32 %v2753_v47, %v2730_v42 }
 0x4ec   : > { %v2777_v0 = vadd.f32 %v2776_v54, %v2754_v19 }
 0x4ef   : > { %2845 = vmatmul.bf16.gmra.mxu1 %v2823_v43 }
 0x4f1   : > { %v2756_v13 = vpop.f32.mrf.mxu1 }
 0x4f2   : > { %v2757_v40 = vadd.f32 %v2756_v13, %v2733_v10 }
 0x4f4   : > { %v2780_v49 = vadd.f32 %v2779_v60, %v2757_v40 }
 0x4f5   : > { %3530 = shalt.err (!%p3527_p5)
}
 0x4f6   : > { %s3584_s18 = smov 128   ;;  %s3585_s26 = smov 8   ;;  %v2786_v30 = vpop.f32.mrf.mxu2  ;;  %v2858_v51 = vpop.permute.xlu1 %2857 }
 0x4f7   : > { %3442 = dma.vmem_to_hbm [thread:$0]  (%p3706_p4), %s2913_s24, 2048, %s2915_s22, %s2891_s16, %s3584_s18, %s3584_s18, %s3585_s26   ;;  %v2863_v45 = vpop.permute.xlu2 %2862  ;;  %v2868_v63 = vpop.permute.xlu0 %2867 }
 0x4f8   : > { %s3441_s28 = smul.u32 40, %s3732_s27  ;;  %s4914_s22 = sld [smem:[#allocation38_spill]] }
 0x4f9   : > { %v2758_v23 = vpop.f32.mrf.mxu1 }
 0x4fa   : > { %v2759_v9 = vadd.f32 %v2758_v23, %v2735_v26 }
 0x4fc   : > { %v2782_v14 = vadd.f32 %v2781_v3, %v2759_v9 }
 0x4fe   : > { %s535_s16 = scalar_lea.vmem %s4914_s22, %s3441_s28  ;;  %v2873_v59 = vpop.permute.xlu1 %2872 }
 0x4ff   : > { %v2878_v22 = vpop.permute.xlu2 %2877 }
 0x501   : > { %v2761_v50 = vpop.f32.mrf.mxu1 }
 0x502   : > { %v2762_v24 = vadd.f32 %v2761_v50, %v2738_v15 }
 0x504   : > { %v2785_v44 = vadd.f32 %v2784_v56, %v2762_v24 }
 0x508   : > { %v2797_v5 = vpop.f32.mrf.mxu0 }
 0x509   : > { %v2798_v53 = vadd.f32 %v2797_v5, %v2775_v61  ;;  %v2763_v17 = vpop.f32.mrf.mxu1 }
 0x510   : > { %v2799_v8 = vpop.f32.mrf.mxu0 }
 0x511   : > { %v2800_v16 = vadd.f32 %v2799_v8, %v2777_v0 }
 0x518   : > { %v2802_v7 = vpop.f32.mrf.mxu0 }
 0x519   : > { %v2803_v33 = vadd.f32 %v2802_v7, %v2780_v49 }
 0x520   : > { %v2804_v2 = vpop.f32.mrf.mxu0 }
 0x521   : > { %v2805_v35 = vadd.f32 %v2804_v2, %v2782_v14 }
 0x528   : > { %v2807_v28 = vpop.f32.mrf.mxu0 }
 0x529   : > { %v2808_v42 = vadd.f32 %v2807_v28, %v2785_v44 }
 0x530   : > { %v2809_v1 = vpop.f32.mrf.mxu0 }
 0x54c   : > { %v2836_v48 = vpop.f32.mrf.mxu1 }
 0x54d   : > { %v2837_v37 = vadd.f32 %v2836_v48, %v2798_v53 }
 0x54f   : > { %v2880_v18 = vadd.f32 %v2858_v51, %v2837_v37 }
 0x551   : > { %2885 = vst [vmem:[%s535_s16] sm:$0xff] %v2880_v18 }
 0x554   : > { %v2838_v39 = vpop.f32.mrf.mxu1 }
 0x555   : > { %v2839_v4 = vadd.f32 %v2838_v39, %v2800_v16 }
 0x557   : > { %v2881_v21 = vadd.f32 %v2863_v45, %v2839_v4 }
 0x559   : > { %2886 = vst [vmem:[%s535_s16 + $0x8] sm:$0xff] %v2881_v21 }
 0x55c   : > { %v2841_v34 = vpop.f32.mrf.mxu1 }
 0x55d   : > { %v2842_v41 = vadd.f32 %v2841_v34, %v2803_v33 }
 0x55f   : > { %v2882_v46 = vadd.f32 %v2868_v63, %v2842_v41 }
 0x561   : > { %2887 = vst [vmem:[%s535_s16 + $0x10] sm:$0xff] %v2882_v46 }
 0x564   : > { %v2843_v10 = vpop.f32.mrf.mxu1 }
 0x565   : > { %v2844_v36 = vadd.f32 %v2843_v10, %v2805_v35 }
 0x567   : > { %v2883_v20 = vadd.f32 %v2873_v59, %v2844_v36 }
 0x569   : > { %2888 = vst [vmem:[%s535_s16 + $0x18] sm:$0xff] %v2883_v20 }
 0x56c   : > { %v2846_v6 = vpop.f32.mrf.mxu1 }
 0x56d   : > { %v2847_v62 = vadd.f32 %v2846_v6, %v2808_v42 }
 0x56f   : > { %v2884_v55 = vadd.f32 %v2878_v22, %v2847_v62 }
 0x571   : > { %2889 = vst [vmem:[%s535_s16 + $0x20] sm:$0xff] %v2884_v55 }
 0x574   : > { %v2848_v25 = vpop.f32.mrf.mxu1 }
 0x575 PF: > { %s4915_s27 = sld [smem:[#allocation8_spill]] }
 0x576   : > { %s4916_s20 = sld [smem:[#allocation5_spill]] }
 0x57b   : > { %p3448_p4 = scmp.ge.s32.totalorder %s4915_s27, 2 }
 0x57c   : > { %s2932_s21 = sand.u32 1, %s4916_s20  }
 0x57d   : > { %p3445_p6 = pnand %p3448_p4, %p3713_p8  ;;  %s2933_s15 = scalar_lea.sflag [#allocation3], %s2932_s21 }
 0x57f   : > { %p3446_p7 = pneg %p3445_p6 }
 0x581   : > { %3556 = dma.done.wait (%p3446_p7), %s2933_s15, 2048  }
 0x582   : > { %3558 = vsyncadd (%p3446_p7), %s2933_s15, 4294965248  ;;  %s29_s23 = sadd.s32 1, %s4915_s27   ;;  %s4918_s25 = sld [smem:[#allocation6_spill]] }
 0x583   : > { %p26_p9 = scmp.ge.s32.totalorder %s29_s23, 4   ;;  %s4919_s20 = sld [smem:[#allocation11_spill]] }
 0x584   : > { %s4920_s21 = sld [smem:[#allocation7_spill]]  ;;  %s4922_s18 = smov %s3565_s19 }
 0x585   : > { %s4921_s22 = sld [smem:[#allocation9_spill]]  ;;  %28 = sbr.rel (!%p26_p9) target bundleno = 6 (0x6), region = 123 }
 0x588   : > { %s4923_s19 = smov %s4918_s25 }
 0x58a   :  { %2950 = vsyncpa [#allocation3], 1 }
 0x58b   :  { %2952 = vsyncpa [#allocation3 + $0x1], 1 }

</bundles_post_ra>
